<compile_context>
chip_gen: v7x
topology: tpu7x:2x2x1
jax: 0.10.0
libtpu: 0.0.40
codegen_flags: <defaults>
</compile_context>

<pallas_src>
import functools
import math

import numpy as np
import jax
import jax.numpy as jnp
from jax.experimental import pallas as pl
from jax.experimental.pallas import tpu as pltpu


# --------------------------------------------------------------------------------------
# Parameter / signal construction (plain JAX glue)
# --------------------------------------------------------------------------------------
def gen_timing_signal(length, channels, min_timescale=1.0, max_timescale=1e4):
    """Port of _gen_timing_signal (tensor2tensor sinusoidal signal)."""
    position = np.arange(length, dtype=np.float64)
    num_timescales = channels // 2
    log_timescale_increment = math.log(float(max_timescale) / float(min_timescale)) / max(
        float(num_timescales) - 1, 1.0
    )
    inv_timescales = min_timescale * np.exp(
        np.arange(num_timescales, dtype=np.float64) * -log_timescale_increment
    )
    scaled_time = position[:, None] * inv_timescales[None, :]
    signal = np.concatenate([np.sin(scaled_time), np.cos(scaled_time)], axis=1)
    signal = np.pad(signal, [[0, 0], [0, channels % 2]], "constant")
    return jnp.asarray(signal.reshape(1, length, channels), dtype=jnp.float32)


def init_encoder_params(key, embedding_size, hidden_size, num_layers, num_heads,
                        total_key_depth, total_value_depth, filter_size, max_length):
    """Deterministic synthetic parameters. Linear weights stored as (in, out) = W^T.
    Per-layer weights are stacked along a leading `num_layers` axis for the fused kernel."""
    keys = list(jax.random.split(key, 1 + 6 * num_layers))
    kit = iter(keys)

    def lin(fan_in, fan_out):
        k = next(kit)
        return (jax.random.normal(k, (fan_in, fan_out), jnp.float32)
                / np.sqrt(fan_in)).astype(jnp.float32)

    def stack_lin(fan_in, fan_out):
        return jnp.stack([lin(fan_in, fan_out) for _ in range(num_layers)], axis=0)

    H, Dk, Dv, Fi = hidden_size, total_key_depth, total_value_depth, filter_size
    params = {
        "num_heads": num_heads,
        "num_layers": num_layers,
        "timing_signal": gen_timing_signal(max_length, H),
        "embed_w": lin(embedding_size, H),                       # (E, H), bias=False
        "ln_g": jnp.ones((1, 1, H), jnp.float32),                # final LayerNorm
        "ln_b": jnp.zeros((1, 1, H), jnp.float32),
        "wq": stack_lin(H, Dk), "wk": stack_lin(H, Dk),
        "wv": stack_lin(H, Dv), "wo": stack_lin(Dv, H),
        "ln1_g": jnp.ones((num_layers, 1, H), jnp.float32),
        "ln1_b": jnp.zeros((num_layers, 1, H), jnp.float32),
        "ln2_g": jnp.ones((num_layers, 1, H), jnp.float32),
        "ln2_b": jnp.zeros((num_layers, 1, H), jnp.float32),
        "w1": stack_lin(H, Fi), "b1": jnp.zeros((num_layers, 1, Fi), jnp.float32),
        "w2": stack_lin(Fi, H), "b2": jnp.zeros((num_layers, 1, H), jnp.float32),
    }
    return params


# --------------------------------------------------------------------------------------
# In-kernel helpers (traced inside the kernel)
# --------------------------------------------------------------------------------------
def _layer_norm(x, gamma, beta, eps=1e-6):
    # Custom LayerNorm used by this codebase: unbiased std (n-1), eps added to std.
    n = x.shape[-1]
    mean = jnp.mean(x, axis=-1, keepdims=True)
    var = jnp.sum((x - mean) ** 2, axis=-1, keepdims=True) * (1.0 / (n - 1))
    inv = pl.reciprocal(jnp.sqrt(var) + eps, approx=True)       # EUP slot
    return gamma * (x - mean) * inv + beta


# --------------------------------------------------------------------------------------
# Fused encoder kernel: one grid step = (one batch row, one encoder layer)
# --------------------------------------------------------------------------------------
def fused_encoder_kernel(num_heads,
                         xin_ref, mask_ref, ts_ref, we_ref,
                         wq_ref, wk_ref, wv_ref, wo_ref,
                         ln1g_ref, ln1b_ref, ln2g_ref, ln2b_ref,
                         w1_ref, b1_ref, w2_ref, b2_ref,
                         lng_ref, lnb_ref,
                         o_ref, x_scr):
    layer = pl.program_id(1)
    n_layers = pl.num_programs(1)
    bf16 = jnp.bfloat16
    f32 = jnp.float32

    # ---- layer 0: embedding projection + timing signal -> residual stream in VMEM ----
    @pl.when(layer == 0)
    def _():
        xin = xin_ref[0]                                              # (L, E) f32
        emb = jnp.dot(xin.astype(bf16), we_ref[...],
                      preferred_element_type=f32)                      # (L, H) f32
        x_scr[...] = emb + ts_ref[0]

    x = x_scr[...]                                                    # (L, H) f32
    key_mask = mask_ref[0] > 0.5                                      # (1, L) True = padded key

    # Broadcast-operands hoisted once per kernel invocation (not per head).
    g1, be1 = ln1g_ref[0], ln1b_ref[0]                                # (1, H) f32
    g2, be2 = ln2g_ref[0], ln2b_ref[0]
    b1, b2 = b1_ref[0], b2_ref[0]                                     # (1, F) / (1, H)

    # ------------------- multi-head self-attention (pre-LN) -------------------
    xn = _layer_norm(x, g1, be1)
    xn_b = xn.astype(bf16)
    q = jnp.dot(xn_b, wq_ref[0], preferred_element_type=f32)          # (L, Dk) f32
    k = jnp.dot(xn_b, wk_ref[0], preferred_element_type=f32)
    v = jnp.dot(xn_b, wv_ref[0], preferred_element_type=f32)          # (L, Dv) f32

    dk = q.shape[-1] // num_heads
    dv = v.shape[-1] // num_heads
    scale = dk ** -0.5

    ctx_heads = []
    for h in range(num_heads):          # static unroll; softmax math stays in f32
        qh = (q[:, h * dk:(h + 1) * dk] * scale).astype(bf16)
        kh = k[:, h * dk:(h + 1) * dk].astype(bf16)
        vh = v[:, h * dv:(h + 1) * dv].astype(bf16)
        logits = jnp.einsum("qd,kd->qk", qh, kh, preferred_element_type=f32)   # (L, L) f32
        logits = jnp.where(key_mask, -1e18, logits)                   # masked_fill(mask, -1e18)
        logits = logits - jnp.max(logits, axis=-1, keepdims=True)
        p = jnp.exp(logits)
        p = p * pl.reciprocal(jnp.sum(p, axis=-1, keepdims=True), approx=True)
        ctx_heads.append(jnp.dot(p.astype(bf16), vh, preferred_element_type=f32))

    # Single full-depth output projection (concat ctx, K = Dv) instead of nh partial sums.
    ctx = jnp.concatenate(ctx_heads, axis=-1)                         # (L, Dv) f32
    attn = jnp.dot(ctx.astype(bf16), wo_ref[0], preferred_element_type=f32)
    x = x + attn                        # residual (layer dropout = identity in eval)

    # ------------------- position-wise feed forward (pre-LN) -------------------
    xn2 = _layer_norm(x, g2, be2)
    h1 = jnp.dot(xn2.astype(bf16), w1_ref[0], preferred_element_type=f32) + b1
    h1 = jnp.maximum(h1, 0.0)
    ffn = jnp.dot(h1.astype(bf16), w2_ref[0], preferred_element_type=f32) + b2
    x = x + ffn                         # residual

    x_scr[...] = x                      # residual stream stays resident in VMEM

    # ------------------- final LayerNorm, written on the last layer -------------------
    @pl.when(layer == n_layers - 1)
    def _():
        o_ref[0] = _layer_norm(x, lng_ref[0], lnb_ref[0])


# --------------------------------------------------------------------------------------
# Wrapper: one fused pallas_call for the whole encoder
# --------------------------------------------------------------------------------------
def encoder_forward(params, inputs, mask):
    """inputs: (B, L, E) float32 ; mask: (B, L) float32 (1.0 = padded/masked key position)."""
    B, L, E = inputs.shape
    H = params["embed_w"].shape[1]
    nL = params["num_layers"]
    nh = params["num_heads"]
    Dk = params["wq"].shape[-1]
    Dv = params["wv"].shape[-1]
    Fi = params["w1"].shape[-1]
    bf16 = jnp.bfloat16

    ts = params["timing_signal"][:, :L, :]                   # (1, L, H) f32
    mask3 = mask.reshape(B, 1, L)                            # (B, 1, L) f32

    # bf16 copies of all MXU weight operands (halves HBM/VMEM traffic; f32 accumulation).
    we = params["embed_w"].astype(bf16)
    wq, wk = params["wq"].astype(bf16), params["wk"].astype(bf16)
    wv, wo = params["wv"].astype(bf16), params["wo"].astype(bf16)
    w1, w2 = params["w1"].astype(bf16), params["w2"].astype(bf16)

    def per_batch(shape):
        return pl.BlockSpec(shape, lambda b, l: (b, 0, 0))

    def shared3(shape):
        return pl.BlockSpec(shape, lambda b, l: (0, 0, 0))

    def per_layer(d1, d2):
        return pl.BlockSpec((1, d1, d2), lambda b, l: (l, 0, 0))

    operands_specs = [
        (inputs, per_batch((1, L, E))),
        (mask3,  per_batch((1, 1, L))),
        (ts,     shared3((1, L, H))),
        (we,     pl.BlockSpec((E, H), lambda b, l: (0, 0))),
        (wq, per_layer(H, Dk)),
        (wk, per_layer(H, Dk)),
        (wv, per_layer(H, Dv)),
        (wo, per_layer(Dv, H)),
        (params["ln1_g"], per_layer(1, H)),
        (params["ln1_b"], per_layer(1, H)),
        (params["ln2_g"], per_layer(1, H)),
        (params["ln2_b"], per_layer(1, H)),
        (w1, per_layer(H, Fi)),
        (params["b1"], per_layer(1, Fi)),
        (w2, per_layer(Fi, H)),
        (params["b2"], per_layer(1, H)),
        (params["ln_g"], shared3((1, 1, H))),
        (params["ln_b"], shared3((1, 1, H))),
    ]
    ops = [o for o, _ in operands_specs]
    specs = [s for _, s in operands_specs]

    kernel = functools.partial(fused_encoder_kernel, nh)

    return pl.pallas_call(
        kernel,
        out_shape=jax.ShapeDtypeStruct((B, L, H), jnp.float32),
        grid_spec=pltpu.PrefetchScalarGridSpec(
            num_scalar_prefetch=0,
            grid=(B, nL),                               # batch (parallel) x layer (arbitrary)
            in_specs=specs,
            out_specs=pl.BlockSpec((1, L, H), lambda b, l: (b, 0, 0)),
            scratch_shapes=[pltpu.VMEM((L, H), jnp.float32)],   # residual stream accumulator
        ),
        compiler_params=pltpu.CompilerParams(
            dimension_semantics=("parallel", "arbitrary"),
            vmem_limit_bytes=48 * 1024 * 1024,
        ),
    )(*ops)


# --------------------------------------------------------------------------------------
# Pure-JAX reference (same math, mirroring the bf16 MXU-operand casts) for a correctness check
# --------------------------------------------------------------------------------------
def encoder_forward_ref(params, inputs, mask):
    f32, bf = jnp.float32, jnp.bfloat16

    def ln(x, g, b, eps=1e-6):
        n = x.shape[-1]
        m = jnp.mean(x, -1, keepdims=True)
        std = jnp.sqrt(jnp.sum((x - m) ** 2, -1, keepdims=True) / (n - 1))
        return g * (x - m) / (std + eps) + b

    def mm(a, w):
        return jnp.einsum("...k,kn->...n", a.astype(bf), w.astype(bf),
                          preferred_element_type=f32)

    B, L, _ = inputs.shape
    nh, nL = params["num_heads"], params["num_layers"]
    x = mm(inputs, params["embed_w"]) + params["timing_signal"][:, :L, :]
    for i in range(nL):
        xn = ln(x, params["ln1_g"][i], params["ln1_b"][i])
        q, k, v = mm(xn, params["wq"][i]), mm(xn, params["wk"][i]), mm(xn, params["wv"][i])
        dk, dv = q.shape[-1] // nh, v.shape[-1] // nh
        ctxs = []
        for h in range(nh):
            qh = (q[..., h * dk:(h + 1) * dk] * dk ** -0.5).astype(bf)
            kh = k[..., h * dk:(h + 1) * dk].astype(bf)
            vh = v[..., h * dv:(h + 1) * dv].astype(bf)
            lo = jnp.einsum("bld,bmd->blm", qh, kh, preferred_element_type=f32)
            lo = jnp.where(mask[:, None, :] > 0.5, -1e18, lo)
            p = jax.nn.softmax(lo, axis=-1)
            ctxs.append(jnp.einsum("blm,bmd->bld", p.astype(bf), vh,
                                   preferred_element_type=f32))
        x = x + mm(jnp.concatenate(ctxs, -1), params["wo"][i])
        xn = ln(x, params["ln2_g"][i], params["ln2_b"][i])
        h1 = jnp.maximum(mm(xn, params["w1"][i]) + params["b1"][i], 0.0)
        x = x + mm(h1, params["w2"][i]) + params["b2"][i]
    return ln(x, params["ln_g"], params["ln_b"])


# --------------------------------------------------------------------------------------
if __name__ == "__main__":
    # Small shapes consistent with the module's [batch, length, hidden] interface.
    # Hidden/key/value/filter dims chosen as multiples of 128 for lane-dense layouts.
    B, L = 2, 8
    embedding_size = 16
    hidden_size = 128
    num_layers = 2
    num_heads = 4
    total_key_depth = 128
    total_value_depth = 128
    filter_size = 256
    max_length = 100

    key = jax.random.PRNGKey(0)
    k_param, k_in = jax.random.split(key)

    params = init_encoder_params(
        k_param, embedding_size, hidden_size, num_layers, num_heads,
        total_key_depth, total_value_depth, filter_size, max_length,
    )

    inputs = jax.random.normal(k_in, (B, L, embedding_size), jnp.float32)
    # mask: 1.0 = padded key position (like input.eq(PAD_idx) in the PyTorch pipeline)
    mask = jnp.zeros((B, L), jnp.float32).at[1, -2:].set(1.0)

    y = encoder_forward(params, inputs, mask)
    y = jax.block_until_ready(y)

    y_ref = encoder_forward_ref(params, inputs, mask)
    assert y.shape == (B, L, hidden_size)
    assert bool(jnp.all(jnp.isfinite(y)))
    max_err = float(jnp.max(jnp.abs(y - y_ref)))
    assert max_err < 5e-2, f"mismatch vs pure-JAX reference: max abs err = {max_err}"

    print("KERNEL_OK")
</pallas_src>

<mosaic_0001>
module attributes {stable_mosaic.version = 11 : i64} {
  func.func @fused_encoder_kernel(%arg0: i32, %arg1: i32, %arg2: memref<1x8x16xf32, #tpu.memory_space<vmem>>, %arg3: memref<1x1x8xf32, #tpu.memory_space<vmem>>, %arg4: memref<1x8x128xf32, #tpu.memory_space<vmem>>, %arg5: memref<16x128xbf16, #tpu.memory_space<vmem>>, %arg6: memref<1x128x128xbf16, #tpu.memory_space<vmem>>, %arg7: memref<1x128x128xbf16, #tpu.memory_space<vmem>>, %arg8: memref<1x128x128xbf16, #tpu.memory_space<vmem>>, %arg9: memref<1x128x128xbf16, #tpu.memory_space<vmem>>, %arg10: memref<1x1x128xf32, #tpu.memory_space<vmem>>, %arg11: memref<1x1x128xf32, #tpu.memory_space<vmem>>, %arg12: memref<1x1x128xf32, #tpu.memory_space<vmem>>, %arg13: memref<1x1x128xf32, #tpu.memory_space<vmem>>, %arg14: memref<1x128x256xbf16, #tpu.memory_space<vmem>>, %arg15: memref<1x1x256xf32, #tpu.memory_space<vmem>>, %arg16: memref<1x256x128xbf16, #tpu.memory_space<vmem>>, %arg17: memref<1x1x128xf32, #tpu.memory_space<vmem>>, %arg18: memref<1x1x128xf32, #tpu.memory_space<vmem>>, %arg19: memref<1x1x128xf32, #tpu.memory_space<vmem>>, %arg20: memref<1x8x128xf32, #tpu.memory_space<vmem>>, %arg21: memref<8x128xf32, #tpu.memory_space<vmem>>) attributes {dimension_semantics = [#tpu.dimension_semantics<parallel>, #tpu.dimension_semantics<arbitrary>], iteration_bounds = array<i64: 2, 2>, scalar_prefetch = 0 : i64, scratch_operands = 1 : i64, tpu.core_type = #tpu.core_type<tc>, window_params = [{transform_indices = @transform_0, window_bounds = array<i64: 1, 8, 16>}, {transform_indices = @transform_1, window_bounds = array<i64: 1, 1, 8>}, {pipeline_mode = #tpu.pipeline_mode<synchronous>, transform_indices = @transform_2, window_bounds = array<i64: 1, 8, 128>}, {pipeline_mode = #tpu.pipeline_mode<synchronous>, transform_indices = @transform_3, window_bounds = array<i64: 16, 128>}, {transform_indices = @transform_4, window_bounds = array<i64: 1, 128, 128>}, {transform_indices = @transform_5, window_bounds = array<i64: 1, 128, 128>}, {transform_indices = @transform_6, window_bounds = array<i64: 1, 128, 128>}, {transform_indices = @transform_7, window_bounds = array<i64: 1, 128, 128>}, {transform_indices = @transform_8, window_bounds = array<i64: 1, 1, 128>}, {transform_indices = @transform_9, window_bounds = array<i64: 1, 1, 128>}, {transform_indices = @transform_10, window_bounds = array<i64: 1, 1, 128>}, {transform_indices = @transform_11, window_bounds = array<i64: 1, 1, 128>}, {transform_indices = @transform_12, window_bounds = array<i64: 1, 128, 256>}, {transform_indices = @transform_13, window_bounds = array<i64: 1, 1, 256>}, {transform_indices = @transform_14, window_bounds = array<i64: 1, 256, 128>}, {transform_indices = @transform_15, window_bounds = array<i64: 1, 1, 128>}, {pipeline_mode = #tpu.pipeline_mode<synchronous>, transform_indices = @transform_16, window_bounds = array<i64: 1, 1, 128>}, {pipeline_mode = #tpu.pipeline_mode<synchronous>, transform_indices = @transform_17, window_bounds = array<i64: 1, 1, 128>}, {transform_indices = @transform_18, window_bounds = array<i64: 1, 8, 128>}]} {
    %c0_i32 = arith.constant 0 : i32
    %0 = arith.cmpi eq, %arg1, %c0_i32 : i32
    %1 = arith.extui %0 : i1 to i32
    %c0_i32_0 = arith.constant 0 : i32
    %2 = arith.cmpi ne, %1, %c0_i32_0 : i32
    scf.if %2 {
      %c0_85 = arith.constant 0 : index
      %c0_86 = arith.constant 0 : index
      %c0_87 = arith.constant 0 : index
      %201 = vector.load %arg2[%c0_85, %c0_86, %c0_87] : memref<1x8x16xf32, #tpu.memory_space<vmem>>, vector<1x8x16xf32>
      %202 = vector.shape_cast %201 : vector<1x8x16xf32> to vector<8x16xf32>
      %203 = arith.truncf %202 : vector<8x16xf32> to vector<8x16xbf16>
      %c0_88 = arith.constant 0 : index
      %c0_89 = arith.constant 0 : index
      %204 = vector.load %arg5[%c0_88, %c0_89] : memref<16x128xbf16, #tpu.memory_space<vmem>>, vector<16x128xbf16>
      %cst_90 = arith.constant dense<0.000000e+00> : vector<8x128xf32>
      %205 = tpu.matmul %203, %204, %cst_90 {dimension_numbers = #tpu.dot_dimension_numbers<[1], [0], [0], [1], [0, 0, 1, 1], [], []>} : vector<8x16xbf16>, vector<16x128xbf16>, vector<8x128xf32> -> vector<8x128xf32>
      %c0_91 = arith.constant 0 : index
      %c0_92 = arith.constant 0 : index
      %c0_93 = arith.constant 0 : index
      %206 = vector.load %arg4[%c0_91, %c0_92, %c0_93] : memref<1x8x128xf32, #tpu.memory_space<vmem>>, vector<1x8x128xf32>
      %207 = vector.shape_cast %206 : vector<1x8x128xf32> to vector<8x128xf32>
      %208 = arith.addf %205, %207 : vector<8x128xf32>
      %c0_94 = arith.constant 0 : index
      %c0_95 = arith.constant 0 : index
      %209 = vector.load %arg21[%c0_94, %c0_95] : memref<8x128xf32, #tpu.memory_space<vmem>>, vector<8x128xf32>
      tpu.vector_store %arg21[%c0_94, %c0_95], %208 {strides = array<i32>} : memref<8x128xf32, #tpu.memory_space<vmem>>, vector<8x128xf32>,
    } else {
    }
    %c0 = arith.constant 0 : index
    %c0_1 = arith.constant 0 : index
    %3 = vector.load %arg21[%c0, %c0_1] : memref<8x128xf32, #tpu.memory_space<vmem>>, vector<8x128xf32>
    %c0_2 = arith.constant 0 : index
    %c0_3 = arith.constant 0 : index
    %c0_4 = arith.constant 0 : index
    %4 = vector.load %arg3[%c0_2, %c0_3, %c0_4] : memref<1x1x8xf32, #tpu.memory_space<vmem>>, vector<1x1x8xf32>
    %5 = vector.shape_cast %4 : vector<1x1x8xf32> to vector<1x8xf32>
    %cst = arith.constant 5.000000e-01 : f32
    %6 = vector.broadcast %cst : f32 to vector<1x8xf32>
    %7 = arith.cmpf ogt, %5, %6 : vector<1x8xf32>
    %c0_5 = arith.constant 0 : index
    %c0_6 = arith.constant 0 : index
    %c0_7 = arith.constant 0 : index
    %8 = vector.load %arg10[%c0_5, %c0_6, %c0_7] : memref<1x1x128xf32, #tpu.memory_space<vmem>>, vector<1x1x128xf32>
    %9 = vector.shape_cast %8 : vector<1x1x128xf32> to vector<1x128xf32>
    %c0_8 = arith.constant 0 : index
    %c0_9 = arith.constant 0 : index
    %c0_10 = arith.constant 0 : index
    %10 = vector.load %arg11[%c0_8, %c0_9, %c0_10] : memref<1x1x128xf32, #tpu.memory_space<vmem>>, vector<1x1x128xf32>
    %11 = vector.shape_cast %10 : vector<1x1x128xf32> to vector<1x128xf32>
    %c0_11 = arith.constant 0 : index
    %c0_12 = arith.constant 0 : index
    %c0_13 = arith.constant 0 : index
    %12 = vector.load %arg12[%c0_11, %c0_12, %c0_13] : memref<1x1x128xf32, #tpu.memory_space<vmem>>, vector<1x1x128xf32>
    %13 = vector.shape_cast %12 : vector<1x1x128xf32> to vector<1x128xf32>
    %c0_14 = arith.constant 0 : index
    %c0_15 = arith.constant 0 : index
    %c0_16 = arith.constant 0 : index
    %14 = vector.load %arg13[%c0_14, %c0_15, %c0_16] : memref<1x1x128xf32, #tpu.memory_space<vmem>>, vector<1x1x128xf32>
    %15 = vector.shape_cast %14 : vector<1x1x128xf32> to vector<1x128xf32>
    %c0_17 = arith.constant 0 : index
    %c0_18 = arith.constant 0 : index
    %c0_19 = arith.constant 0 : index
    %16 = vector.load %arg15[%c0_17, %c0_18, %c0_19] : memref<1x1x256xf32, #tpu.memory_space<vmem>>, vector<1x1x256xf32>
    %17 = vector.shape_cast %16 : vector<1x1x256xf32> to vector<1x256xf32>
    %c0_20 = arith.constant 0 : index
    %c0_21 = arith.constant 0 : index
    %c0_22 = arith.constant 0 : index
    %18 = vector.load %arg17[%c0_20, %c0_21, %c0_22] : memref<1x1x128xf32, #tpu.memory_space<vmem>>, vector<1x1x128xf32>
    %19 = vector.shape_cast %18 : vector<1x1x128xf32> to vector<1x128xf32>
    %cst_23 = arith.constant dense<0.000000e+00> : vector<8xf32>
    %20 = vector.multi_reduction <add>, %3, %cst_23 [1] : vector<8x128xf32> to vector<8xf32>
    %21 = vector.shape_cast %20 : vector<8xf32> to vector<8x1xf32>
    %cst_24 = arith.constant 1.280000e+02 : f32
    %22 = vector.broadcast %cst_24 : f32 to vector<8x1xf32>
    %23 = arith.divf %21, %22 : vector<8x1xf32>
    %24 = vector.broadcast %23 : vector<8x1xf32> to vector<8x128xf32>
    %25 = arith.subf %3, %24 : vector<8x128xf32>
    %26 = arith.mulf %25, %25 : vector<8x128xf32>
    %cst_25 = arith.constant dense<0.000000e+00> : vector<8xf32>
    %27 = vector.multi_reduction <add>, %26, %cst_25 [1] : vector<8x128xf32> to vector<8xf32>
    %28 = vector.shape_cast %27 : vector<8xf32> to vector<8x1xf32>
    %cst_26 = arith.constant 0.00787401571 : f32
    %29 = vector.broadcast %cst_26 : f32 to vector<8x1xf32>
    %30 = arith.mulf %28, %29 : vector<8x1xf32>
    %31 = math.sqrt %30 : vector<8x1xf32>
    %cst_27 = arith.constant 9.99999997E-7 : f32
    %32 = vector.broadcast %cst_27 : f32 to vector<8x1xf32>
    %33 = arith.addf %31, %32 : vector<8x1xf32>
    %34 = tpu.reciprocal %33 {approx = true} : vector<8x1xf32> -> vector<8x1xf32>
    %35 = vector.broadcast %23 : vector<8x1xf32> to vector<8x128xf32>
    %36 = arith.subf %3, %35 : vector<8x128xf32>
    %37 = vector.broadcast %9 : vector<1x128xf32> to vector<8x128xf32>
    %38 = arith.mulf %37, %36 : vector<8x128xf32>
    %39 = vector.broadcast %34 : vector<8x1xf32> to vector<8x128xf32>
    %40 = arith.mulf %38, %39 : vector<8x128xf32>
    %41 = vector.broadcast %11 : vector<1x128xf32> to vector<8x128xf32>
    %42 = arith.addf %40, %41 : vector<8x128xf32>
    %43 = arith.truncf %42 : vector<8x128xf32> to vector<8x128xbf16>
    %c0_28 = arith.constant 0 : index
    %c0_29 = arith.constant 0 : index
    %c0_30 = arith.constant 0 : index
    %44 = vector.load %arg6[%c0_28, %c0_29, %c0_30] : memref<1x128x128xbf16, #tpu.memory_space<vmem>>, vector<1x128x128xbf16>
    %45 = vector.shape_cast %44 : vector<1x128x128xbf16> to vector<128x128xbf16>
    %cst_31 = arith.constant dense<0.000000e+00> : vector<8x128xf32>
    %46 = tpu.matmul %43, %45, %cst_31 {dimension_numbers = #tpu.dot_dimension_numbers<[1], [0], [0], [1], [0, 0, 1, 1], [], []>} : vector<8x128xbf16>, vector<128x128xbf16>, vector<8x128xf32> -> vector<8x128xf32>
    %c0_32 = arith.constant 0 : index
    %c0_33 = arith.constant 0 : index
    %c0_34 = arith.constant 0 : index
    %47 = vector.load %arg7[%c0_32, %c0_33, %c0_34] : memref<1x128x128xbf16, #tpu.memory_space<vmem>>, vector<1x128x128xbf16>
    %48 = vector.shape_cast %47 : vector<1x128x128xbf16> to vector<128x128xbf16>
    %cst_35 = arith.constant dense<0.000000e+00> : vector<8x128xf32>
    %49 = tpu.matmul %43, %48, %cst_35 {dimension_numbers = #tpu.dot_dimension_numbers<[1], [0], [0], [1], [0, 0, 1, 1], [], []>} : vector<8x128xbf16>, vector<128x128xbf16>, vector<8x128xf32> -> vector<8x128xf32>
    %c0_36 = arith.constant 0 : index
    %c0_37 = arith.constant 0 : index
    %c0_38 = arith.constant 0 : index
    %50 = vector.load %arg8[%c0_36, %c0_37, %c0_38] : memref<1x128x128xbf16, #tpu.memory_space<vmem>>, vector<1x128x128xbf16>
    %51 = vector.shape_cast %50 : vector<1x128x128xbf16> to vector<128x128xbf16>
    %cst_39 = arith.constant dense<0.000000e+00> : vector<8x128xf32>
    %52 = tpu.matmul %43, %51, %cst_39 {dimension_numbers = #tpu.dot_dimension_numbers<[1], [0], [0], [1], [0, 0, 1, 1], [], []>} : vector<8x128xbf16>, vector<128x128xbf16>, vector<8x128xf32> -> vector<8x128xf32>
    %53 = vector.extract_strided_slice %46 {offsets = [0, 0], sizes = [8, 32], strides = [1, 1]} : vector<8x128xf32> to vector<8x32xf32>
    %cst_40 = arith.constant 0.176776692 : f32
    %54 = vector.broadcast %cst_40 : f32 to vector<8x32xf32>
    %55 = arith.mulf %53, %54 : vector<8x32xf32>
    %56 = arith.truncf %55 : vector<8x32xf32> to vector<8x32xbf16>
    %57 = vector.extract_strided_slice %49 {offsets = [0, 0], sizes = [8, 32], strides = [1, 1]} : vector<8x128xf32> to vector<8x32xf32>
    %58 = arith.truncf %57 : vector<8x32xf32> to vector<8x32xbf16>
    %59 = vector.extract_strided_slice %52 {offsets = [0, 0], sizes = [8, 32], strides = [1, 1]} : vector<8x128xf32> to vector<8x32xf32>
    %60 = arith.truncf %59 : vector<8x32xf32> to vector<8x32xbf16>
    "tpu.trace_start"() <{level = 10 : i32, message = "qd,kd->qk"}> : () -> ()
    %cst_41 = arith.constant dense<0.000000e+00> : vector<8x8xf32>
    %61 = tpu.matmul %56, %58, %cst_41 {dimension_numbers = #tpu.dot_dimension_numbers<[1], [1], [0], [0], [0, 0, 1, 0], [], []>} : vector<8x32xbf16>, vector<8x32xbf16>, vector<8x8xf32> -> vector<8x8xf32>
    %cst_42 = arith.constant -9.99999984E+17 : f32
    "tpu.trace_stop"() : () -> ()
    %62 = vector.shape_cast %7 : vector<1x8xi1> to vector<1x8xi1>
    %63 = vector.broadcast %62 : vector<1x8xi1> to vector<8x8xi1>
    %64 = vector.broadcast %cst_42 : f32 to vector<8x8xf32>
    %65 = arith.select %63, %64, %61 : vector<8x8xi1>, vector<8x8xf32>
    %cst_43 = arith.constant dense<0xFF800000> : vector<8xf32>
    %66 = vector.multi_reduction <maximumf>, %65, %cst_43 [1] : vector<8x8xf32> to vector<8xf32>
    %67 = vector.shape_cast %66 : vector<8xf32> to vector<8x1xf32>
    %68 = vector.broadcast %67 : vector<8x1xf32> to vector<8x8xf32>
    %69 = arith.subf %65, %68 : vector<8x8xf32>
    %70 = math.exp %69 : vector<8x8xf32>
    %cst_44 = arith.constant dense<0.000000e+00> : vector<8xf32>
    %71 = vector.multi_reduction <add>, %70, %cst_44 [1] : vector<8x8xf32> to vector<8xf32>
    %72 = vector.shape_cast %71 : vector<8xf32> to vector<8x1xf32>
    %73 = tpu.reciprocal %72 {approx = true} : vector<8x1xf32> -> vector<8x1xf32>
    %74 = vector.broadcast %73 : vector<8x1xf32> to vector<8x8xf32>
    %75 = arith.mulf %70, %74 : vector<8x8xf32>
    %76 = arith.truncf %75 : vector<8x8xf32> to vector<8x8xbf16>
    %cst_45 = arith.constant dense<0.000000e+00> : vector<8x32xf32>
    %77 = tpu.matmul %76, %60, %cst_45 {dimension_numbers = #tpu.dot_dimension_numbers<[1], [0], [0], [1], [0, 0, 1, 1], [], []>} : vector<8x8xbf16>, vector<8x32xbf16>, vector<8x32xf32> -> vector<8x32xf32>
    %78 = vector.extract_strided_slice %46 {offsets = [0, 32], sizes = [8, 32], strides = [1, 1]} : vector<8x128xf32> to vector<8x32xf32>
    %cst_46 = arith.constant 0.176776692 : f32
    %79 = vector.broadcast %cst_46 : f32 to vector<8x32xf32>
    %80 = arith.mulf %78, %79 : vector<8x32xf32>
    %81 = arith.truncf %80 : vector<8x32xf32> to vector<8x32xbf16>
    %82 = vector.extract_strided_slice %49 {offsets = [0, 32], sizes = [8, 32], strides = [1, 1]} : vector<8x128xf32> to vector<8x32xf32>
    %83 = arith.truncf %82 : vector<8x32xf32> to vector<8x32xbf16>
    %84 = vector.extract_strided_slice %52 {offsets = [0, 32], sizes = [8, 32], strides = [1, 1]} : vector<8x128xf32> to vector<8x32xf32>
    %85 = arith.truncf %84 : vector<8x32xf32> to vector<8x32xbf16>
    "tpu.trace_start"() <{level = 10 : i32, message = "qd,kd->qk"}> : () -> ()
    %cst_47 = arith.constant dense<0.000000e+00> : vector<8x8xf32>
    %86 = tpu.matmul %81, %83, %cst_47 {dimension_numbers = #tpu.dot_dimension_numbers<[1], [1], [0], [0], [0, 0, 1, 0], [], []>} : vector<8x32xbf16>, vector<8x32xbf16>, vector<8x8xf32> -> vector<8x8xf32>
    %cst_48 = arith.constant -9.99999984E+17 : f32
    "tpu.trace_stop"() : () -> ()
    %87 = vector.shape_cast %7 : vector<1x8xi1> to vector<1x8xi1>
    %88 = vector.broadcast %87 : vector<1x8xi1> to vector<8x8xi1>
    %89 = vector.broadcast %cst_48 : f32 to vector<8x8xf32>
    %90 = arith.select %88, %89, %86 : vector<8x8xi1>, vector<8x8xf32>
    %cst_49 = arith.constant dense<0xFF800000> : vector<8xf32>
    %91 = vector.multi_reduction <maximumf>, %90, %cst_49 [1] : vector<8x8xf32> to vector<8xf32>
    %92 = vector.shape_cast %91 : vector<8xf32> to vector<8x1xf32>
    %93 = vector.broadcast %92 : vector<8x1xf32> to vector<8x8xf32>
    %94 = arith.subf %90, %93 : vector<8x8xf32>
    %95 = math.exp %94 : vector<8x8xf32>
    %cst_50 = arith.constant dense<0.000000e+00> : vector<8xf32>
    %96 = vector.multi_reduction <add>, %95, %cst_50 [1] : vector<8x8xf32> to vector<8xf32>
    %97 = vector.shape_cast %96 : vector<8xf32> to vector<8x1xf32>
    %98 = tpu.reciprocal %97 {approx = true} : vector<8x1xf32> -> vector<8x1xf32>
    %99 = vector.broadcast %98 : vector<8x1xf32> to vector<8x8xf32>
    %100 = arith.mulf %95, %99 : vector<8x8xf32>
    %101 = arith.truncf %100 : vector<8x8xf32> to vector<8x8xbf16>
    %cst_51 = arith.constant dense<0.000000e+00> : vector<8x32xf32>
    %102 = tpu.matmul %101, %85, %cst_51 {dimension_numbers = #tpu.dot_dimension_numbers<[1], [0], [0], [1], [0, 0, 1, 1], [], []>} : vector<8x8xbf16>, vector<8x32xbf16>, vector<8x32xf32> -> vector<8x32xf32>
    %103 = vector.extract_strided_slice %46 {offsets = [0, 64], sizes = [8, 32], strides = [1, 1]} : vector<8x128xf32> to vector<8x32xf32>
    %cst_52 = arith.constant 0.176776692 : f32
    %104 = vector.broadcast %cst_52 : f32 to vector<8x32xf32>
    %105 = arith.mulf %103, %104 : vector<8x32xf32>
    %106 = arith.truncf %105 : vector<8x32xf32> to vector<8x32xbf16>
    %107 = vector.extract_strided_slice %49 {offsets = [0, 64], sizes = [8, 32], strides = [1, 1]} : vector<8x128xf32> to vector<8x32xf32>
    %108 = arith.truncf %107 : vector<8x32xf32> to vector<8x32xbf16>
    %109 = vector.extract_strided_slice %52 {offsets = [0, 64], sizes = [8, 32], strides = [1, 1]} : vector<8x128xf32> to vector<8x32xf32>
    %110 = arith.truncf %109 : vector<8x32xf32> to vector<8x32xbf16>
    "tpu.trace_start"() <{level = 10 : i32, message = "qd,kd->qk"}> : () -> ()
    %cst_53 = arith.constant dense<0.000000e+00> : vector<8x8xf32>
    %111 = tpu.matmul %106, %108, %cst_53 {dimension_numbers = #tpu.dot_dimension_numbers<[1], [1], [0], [0], [0, 0, 1, 0], [], []>} : vector<8x32xbf16>, vector<8x32xbf16>, vector<8x8xf32> -> vector<8x8xf32>
    %cst_54 = arith.constant -9.99999984E+17 : f32
    "tpu.trace_stop"() : () -> ()
    %112 = vector.shape_cast %7 : vector<1x8xi1> to vector<1x8xi1>
    %113 = vector.broadcast %112 : vector<1x8xi1> to vector<8x8xi1>
    %114 = vector.broadcast %cst_54 : f32 to vector<8x8xf32>
    %115 = arith.select %113, %114, %111 : vector<8x8xi1>, vector<8x8xf32>
    %cst_55 = arith.constant dense<0xFF800000> : vector<8xf32>
    %116 = vector.multi_reduction <maximumf>, %115, %cst_55 [1] : vector<8x8xf32> to vector<8xf32>
    %117 = vector.shape_cast %116 : vector<8xf32> to vector<8x1xf32>
    %118 = vector.broadcast %117 : vector<8x1xf32> to vector<8x8xf32>
    %119 = arith.subf %115, %118 : vector<8x8xf32>
    %120 = math.exp %119 : vector<8x8xf32>
    %cst_56 = arith.constant dense<0.000000e+00> : vector<8xf32>
    %121 = vector.multi_reduction <add>, %120, %cst_56 [1] : vector<8x8xf32> to vector<8xf32>
    %122 = vector.shape_cast %121 : vector<8xf32> to vector<8x1xf32>
    %123 = tpu.reciprocal %122 {approx = true} : vector<8x1xf32> -> vector<8x1xf32>
    %124 = vector.broadcast %123 : vector<8x1xf32> to vector<8x8xf32>
    %125 = arith.mulf %120, %124 : vector<8x8xf32>
    %126 = arith.truncf %125 : vector<8x8xf32> to vector<8x8xbf16>
    %cst_57 = arith.constant dense<0.000000e+00> : vector<8x32xf32>
    %127 = tpu.matmul %126, %110, %cst_57 {dimension_numbers = #tpu.dot_dimension_numbers<[1], [0], [0], [1], [0, 0, 1, 1], [], []>} : vector<8x8xbf16>, vector<8x32xbf16>, vector<8x32xf32> -> vector<8x32xf32>
    %128 = vector.extract_strided_slice %46 {offsets = [0, 96], sizes = [8, 32], strides = [1, 1]} : vector<8x128xf32> to vector<8x32xf32>
    %cst_58 = arith.constant 0.176776692 : f32
    %129 = vector.broadcast %cst_58 : f32 to vector<8x32xf32>
    %130 = arith.mulf %128, %129 : vector<8x32xf32>
    %131 = arith.truncf %130 : vector<8x32xf32> to vector<8x32xbf16>
    %132 = vector.extract_strided_slice %49 {offsets = [0, 96], sizes = [8, 32], strides = [1, 1]} : vector<8x128xf32> to vector<8x32xf32>
    %133 = arith.truncf %132 : vector<8x32xf32> to vector<8x32xbf16>
    %134 = vector.extract_strided_slice %52 {offsets = [0, 96], sizes = [8, 32], strides = [1, 1]} : vector<8x128xf32> to vector<8x32xf32>
    %135 = arith.truncf %134 : vector<8x32xf32> to vector<8x32xbf16>
    "tpu.trace_start"() <{level = 10 : i32, message = "qd,kd->qk"}> : () -> ()
    %cst_59 = arith.constant dense<0.000000e+00> : vector<8x8xf32>
    %136 = tpu.matmul %131, %133, %cst_59 {dimension_numbers = #tpu.dot_dimension_numbers<[1], [1], [0], [0], [0, 0, 1, 0], [], []>} : vector<8x32xbf16>, vector<8x32xbf16>, vector<8x8xf32> -> vector<8x8xf32>
    %cst_60 = arith.constant -9.99999984E+17 : f32
    "tpu.trace_stop"() : () -> ()
    %137 = vector.shape_cast %7 : vector<1x8xi1> to vector<1x8xi1>
    %138 = vector.broadcast %137 : vector<1x8xi1> to vector<8x8xi1>
    %139 = vector.broadcast %cst_60 : f32 to vector<8x8xf32>
    %140 = arith.select %138, %139, %136 : vector<8x8xi1>, vector<8x8xf32>
    %cst_61 = arith.constant dense<0xFF800000> : vector<8xf32>
    %141 = vector.multi_reduction <maximumf>, %140, %cst_61 [1] : vector<8x8xf32> to vector<8xf32>
    %142 = vector.shape_cast %141 : vector<8xf32> to vector<8x1xf32>
    %143 = vector.broadcast %142 : vector<8x1xf32> to vector<8x8xf32>
    %144 = arith.subf %140, %143 : vector<8x8xf32>
    %145 = math.exp %144 : vector<8x8xf32>
    %cst_62 = arith.constant dense<0.000000e+00> : vector<8xf32>
    %146 = vector.multi_reduction <add>, %145, %cst_62 [1] : vector<8x8xf32> to vector<8xf32>
    %147 = vector.shape_cast %146 : vector<8xf32> to vector<8x1xf32>
    %148 = tpu.reciprocal %147 {approx = true} : vector<8x1xf32> -> vector<8x1xf32>
    %149 = vector.broadcast %148 : vector<8x1xf32> to vector<8x8xf32>
    %150 = arith.mulf %145, %149 : vector<8x8xf32>
    %151 = arith.truncf %150 : vector<8x8xf32> to vector<8x8xbf16>
    %cst_63 = arith.constant dense<0.000000e+00> : vector<8x32xf32>
    %152 = tpu.matmul %151, %135, %cst_63 {dimension_numbers = #tpu.dot_dimension_numbers<[1], [0], [0], [1], [0, 0, 1, 1], [], []>} : vector<8x8xbf16>, vector<8x32xbf16>, vector<8x32xf32> -> vector<8x32xf32>
    %153 = tpu.concatenate %77, %102, %127, %152 in 1 : vector<8x32xf32>, vector<8x32xf32>, vector<8x32xf32>, vector<8x32xf32> -> vector<8x128xf32>
    %154 = arith.truncf %153 : vector<8x128xf32> to vector<8x128xbf16>
    %c0_64 = arith.constant 0 : index
    %c0_65 = arith.constant 0 : index
    %c0_66 = arith.constant 0 : index
    %155 = vector.load %arg9[%c0_64, %c0_65, %c0_66] : memref<1x128x128xbf16, #tpu.memory_space<vmem>>, vector<1x128x128xbf16>
    %156 = vector.shape_cast %155 : vector<1x128x128xbf16> to vector<128x128xbf16>
    %cst_67 = arith.constant dense<0.000000e+00> : vector<8x128xf32>
    %157 = tpu.matmul %154, %156, %cst_67 {dimension_numbers = #tpu.dot_dimension_numbers<[1], [0], [0], [1], [0, 0, 1, 1], [], []>} : vector<8x128xbf16>, vector<128x128xbf16>, vector<8x128xf32> -> vector<8x128xf32>
    %158 = arith.addf %3, %157 : vector<8x128xf32>
    %cst_68 = arith.constant dense<0.000000e+00> : vector<8xf32>
    %159 = vector.multi_reduction <add>, %158, %cst_68 [1] : vector<8x128xf32> to vector<8xf32>
    %160 = vector.shape_cast %159 : vector<8xf32> to vector<8x1xf32>
    %cst_69 = arith.constant 1.280000e+02 : f32
    %161 = vector.broadcast %cst_69 : f32 to vector<8x1xf32>
    %162 = arith.divf %160, %161 : vector<8x1xf32>
    %163 = vector.broadcast %162 : vector<8x1xf32> to vector<8x128xf32>
    %164 = arith.subf %158, %163 : vector<8x128xf32>
    %165 = arith.mulf %164, %164 : vector<8x128xf32>
    %cst_70 = arith.constant dense<0.000000e+00> : vector<8xf32>
    %166 = vector.multi_reduction <add>, %165, %cst_70 [1] : vector<8x128xf32> to vector<8xf32>
    %167 = vector.shape_cast %166 : vector<8xf32> to vector<8x1xf32>
    %cst_71 = arith.constant 0.00787401571 : f32
    %168 = vector.broadcast %cst_71 : f32 to vector<8x1xf32>
    %169 = arith.mulf %167, %168 : vector<8x1xf32>
    %170 = math.sqrt %169 : vector<8x1xf32>
    %cst_72 = arith.constant 9.99999997E-7 : f32
    %171 = vector.broadcast %cst_72 : f32 to vector<8x1xf32>
    %172 = arith.addf %170, %171 : vector<8x1xf32>
    %173 = tpu.reciprocal %172 {approx = true} : vector<8x1xf32> -> vector<8x1xf32>
    %174 = vector.broadcast %162 : vector<8x1xf32> to vector<8x128xf32>
    %175 = arith.subf %158, %174 : vector<8x128xf32>
    %176 = vector.broadcast %13 : vector<1x128xf32> to vector<8x128xf32>
    %177 = arith.mulf %176, %175 : vector<8x128xf32>
    %178 = vector.broadcast %173 : vector<8x1xf32> to vector<8x128xf32>
    %179 = arith.mulf %177, %178 : vector<8x128xf32>
    %180 = vector.broadcast %15 : vector<1x128xf32> to vector<8x128xf32>
    %181 = arith.addf %179, %180 : vector<8x128xf32>
    %182 = arith.truncf %181 : vector<8x128xf32> to vector<8x128xbf16>
    %c0_73 = arith.constant 0 : index
    %c0_74 = arith.constant 0 : index
    %c0_75 = arith.constant 0 : index
    %183 = vector.load %arg14[%c0_73, %c0_74, %c0_75] : memref<1x128x256xbf16, #tpu.memory_space<vmem>>, vector<1x128x256xbf16>
    %184 = vector.shape_cast %183 : vector<1x128x256xbf16> to vector<128x256xbf16>
    %cst_76 = arith.constant dense<0.000000e+00> : vector<8x256xf32>
    %185 = tpu.matmul %182, %184, %cst_76 {dimension_numbers = #tpu.dot_dimension_numbers<[1], [0], [0], [1], [0, 0, 1, 1], [], []>} : vector<8x128xbf16>, vector<128x256xbf16>, vector<8x256xf32> -> vector<8x256xf32>
    %186 = vector.broadcast %17 : vector<1x256xf32> to vector<8x256xf32>
    %187 = arith.addf %185, %186 : vector<8x256xf32>
    %cst_77 = arith.constant 0.000000e+00 : f32
    %188 = vector.broadcast %cst_77 : f32 to vector<8x256xf32>
    %189 = arith.maximumf %187, %188 : vector<8x256xf32>
    %190 = arith.truncf %189 : vector<8x256xf32> to vector<8x256xbf16>
    %c0_78 = arith.constant 0 : index
    %c0_79 = arith.constant 0 : index
    %c0_80 = arith.constant 0 : index
    %191 = vector.load %arg16[%c0_78, %c0_79, %c0_80] : memref<1x256x128xbf16, #tpu.memory_space<vmem>>, vector<1x256x128xbf16>
    %192 = vector.shape_cast %191 : vector<1x256x128xbf16> to vector<256x128xbf16>
    %cst_81 = arith.constant dense<0.000000e+00> : vector<8x128xf32>
    %193 = tpu.matmul %190, %192, %cst_81 {dimension_numbers = #tpu.dot_dimension_numbers<[1], [0], [0], [1], [0, 0, 1, 1], [], []>} : vector<8x256xbf16>, vector<256x128xbf16>, vector<8x128xf32> -> vector<8x128xf32>
    %194 = vector.broadcast %19 : vector<1x128xf32> to vector<8x128xf32>
    %195 = arith.addf %193, %194 : vector<8x128xf32>
    %196 = arith.addf %158, %195 : vector<8x128xf32>
    %c0_82 = arith.constant 0 : index
    %c0_83 = arith.constant 0 : index
    %197 = vector.load %arg21[%c0_82, %c0_83] : memref<8x128xf32, #tpu.memory_space<vmem>>, vector<8x128xf32>
    tpu.vector_store %arg21[%c0_82, %c0_83], %196 {strides = array<i32>} : memref<8x128xf32, #tpu.memory_space<vmem>>, vector<8x128xf32>,
    %c1_i32 = arith.constant 1 : i32
    %198 = arith.cmpi eq, %arg1, %c1_i32 : i32
    %199 = arith.extui %198 : i1 to i32
    %c0_i32_84 = arith.constant 0 : i32
    %200 = arith.cmpi ne, %199, %c0_i32_84 : i32
    scf.if %200 {
      %c0_85 = arith.constant 0 : index
      %c0_86 = arith.constant 0 : index
      %c0_87 = arith.constant 0 : index
      %201 = vector.load %arg18[%c0_85, %c0_86, %c0_87] : memref<1x1x128xf32, #tpu.memory_space<vmem>>, vector<1x1x128xf32>
      %202 = vector.shape_cast %201 : vector<1x1x128xf32> to vector<1x128xf32>
      %c0_88 = arith.constant 0 : index
      %c0_89 = arith.constant 0 : index
      %c0_90 = arith.constant 0 : index
      %203 = vector.load %arg19[%c0_88, %c0_89, %c0_90] : memref<1x1x128xf32, #tpu.memory_space<vmem>>, vector<1x1x128xf32>
      %204 = vector.shape_cast %203 : vector<1x1x128xf32> to vector<1x128xf32>
      %cst_91 = arith.constant dense<0.000000e+00> : vector<8xf32>
      %205 = vector.multi_reduction <add>, %196, %cst_91 [1] : vector<8x128xf32> to vector<8xf32>
      %206 = vector.shape_cast %205 : vector<8xf32> to vector<8x1xf32>
      %cst_92 = arith.constant 1.280000e+02 : f32
      %207 = vector.broadcast %cst_92 : f32 to vector<8x1xf32>
      %208 = arith.divf %206, %207 : vector<8x1xf32>
      %209 = vector.broadcast %208 : vector<8x1xf32> to vector<8x128xf32>
      %210 = arith.subf %196, %209 : vector<8x128xf32>
      %211 = arith.mulf %210, %210 : vector<8x128xf32>
      %cst_93 = arith.constant dense<0.000000e+00> : vector<8xf32>
      %212 = vector.multi_reduction <add>, %211, %cst_93 [1] : vector<8x128xf32> to vector<8xf32>
      %213 = vector.shape_cast %212 : vector<8xf32> to vector<8x1xf32>
      %cst_94 = arith.constant 0.00787401571 : f32
      %214 = vector.broadcast %cst_94 : f32 to vector<8x1xf32>
      %215 = arith.mulf %213, %214 : vector<8x1xf32>
      %216 = math.sqrt %215 : vector<8x1xf32>
      %cst_95 = arith.constant 9.99999997E-7 : f32
      %217 = vector.broadcast %cst_95 : f32 to vector<8x1xf32>
      %218 = arith.addf %216, %217 : vector<8x1xf32>
      %219 = tpu.reciprocal %218 {approx = true} : vector<8x1xf32> -> vector<8x1xf32>
      %220 = vector.broadcast %208 : vector<8x1xf32> to vector<8x128xf32>
      %221 = arith.subf %196, %220 : vector<8x128xf32>
      %222 = vector.broadcast %202 : vector<1x128xf32> to vector<8x128xf32>
      %223 = arith.mulf %222, %221 : vector<8x128xf32>
      %224 = vector.broadcast %219 : vector<8x1xf32> to vector<8x128xf32>
      %225 = arith.mulf %223, %224 : vector<8x128xf32>
      %226 = vector.broadcast %204 : vector<1x128xf32> to vector<8x128xf32>
      %227 = arith.addf %225, %226 : vector<8x128xf32>
      %c0_96 = arith.constant 0 : index
      %c0_97 = arith.constant 0 : index
      %c0_98 = arith.constant 0 : index
      %228 = vector.load %arg20[%c0_96, %c0_97, %c0_98] : memref<1x8x128xf32, #tpu.memory_space<vmem>>, vector<1x8x128xf32>
      %229 = vector.shape_cast %228 : vector<1x8x128xf32> to vector<8x128xf32>
      %230 = vector.shape_cast %227 : vector<8x128xf32> to vector<1x8x128xf32>
      tpu.vector_store %arg20[%c0_96, %c0_97, %c0_98], %230 {strides = array<i32>} : memref<1x8x128xf32, #tpu.memory_space<vmem>>, vector<1x8x128xf32>,
    } else {
    }
    return
  }
  func.func @transform_0(%arg0: i32, %arg1: i32) -> (i32, i32, i32) {
    %c0_i32 = arith.constant 0 : i32
    %c0_i32_0 = arith.constant 0 : i32
    %c0_i32_1 = arith.constant 0 : i32
    return %arg0, %c0_i32, %c0_i32_0 : i32, i32, i32
  }
  func.func @transform_1(%arg0: i32, %arg1: i32) -> (i32, i32, i32) {
    %c0_i32 = arith.constant 0 : i32
    %c0_i32_0 = arith.constant 0 : i32
    %c0_i32_1 = arith.constant 0 : i32
    return %arg0, %c0_i32, %c0_i32_0 : i32, i32, i32
  }
  func.func @transform_2(%arg0: i32, %arg1: i32) -> (i32, i32, i32) {
    %c0_i32 = arith.constant 0 : i32
    %c0_i32_0 = arith.constant 0 : i32
    %c0_i32_1 = arith.constant 0 : i32
    %c0_i32_2 = arith.constant 0 : i32
    return %c0_i32, %c0_i32_0, %c0_i32_1 : i32, i32, i32
  }
  func.func @transform_3(%arg0: i32, %arg1: i32) -> (i32, i32) {
    %c0_i32 = arith.constant 0 : i32
    %c0_i32_0 = arith.constant 0 : i32
    %c0_i32_1 = arith.constant 0 : i32
    return %c0_i32, %c0_i32_0 : i32, i32
  }
  func.func @transform_4(%arg0: i32, %arg1: i32) -> (i32, i32, i32) {
    %c0_i32 = arith.constant 0 : i32
    %c0_i32_0 = arith.constant 0 : i32
    %c0_i32_1 = arith.constant 0 : i32
    return %arg1, %c0_i32, %c0_i32_0 : i32, i32, i32
  }
  func.func @transform_5(%arg0: i32, %arg1: i32) -> (i32, i32, i32) {
    %c0_i32 = arith.constant 0 : i32
    %c0_i32_0 = arith.constant 0 : i32
    %c0_i32_1 = arith.constant 0 : i32
    return %arg1, %c0_i32, %c0_i32_0 : i32, i32, i32
  }
  func.func @transform_6(%arg0: i32, %arg1: i32) -> (i32, i32, i32) {
    %c0_i32 = arith.constant 0 : i32
    %c0_i32_0 = arith.constant 0 : i32
    %c0_i32_1 = arith.constant 0 : i32
    return %arg1, %c0_i32, %c0_i32_0 : i32, i32, i32
  }
  func.func @transform_7(%arg0: i32, %arg1: i32) -> (i32, i32, i32) {
    %c0_i32 = arith.constant 0 : i32
    %c0_i32_0 = arith.constant 0 : i32
    %c0_i32_1 = arith.constant 0 : i32
    return %arg1, %c0_i32, %c0_i32_0 : i32, i32, i32
  }
  func.func @transform_8(%arg0: i32, %arg1: i32) -> (i32, i32, i32) {
    %c0_i32 = arith.constant 0 : i32
    %c0_i32_0 = arith.constant 0 : i32
    %c0_i32_1 = arith.constant 0 : i32
    return %arg1, %c0_i32, %c0_i32_0 : i32, i32, i32
  }
  func.func @transform_9(%arg0: i32, %arg1: i32) -> (i32, i32, i32) {
    %c0_i32 = arith.constant 0 : i32
    %c0_i32_0 = arith.constant 0 : i32
    %c0_i32_1 = arith.constant 0 : i32
    return %arg1, %c0_i32, %c0_i32_0 : i32, i32, i32
  }
  func.func @transform_10(%arg0: i32, %arg1: i32) -> (i32, i32, i32) {
    %c0_i32 = arith.constant 0 : i32
    %c0_i32_0 = arith.constant 0 : i32
    %c0_i32_1 = arith.constant 0 : i32
    return %arg1, %c0_i32, %c0_i32_0 : i32, i32, i32
  }
  func.func @transform_11(%arg0: i32, %arg1: i32) -> (i32, i32, i32) {
    %c0_i32 = arith.constant 0 : i32
    %c0_i32_0 = arith.constant 0 : i32
    %c0_i32_1 = arith.constant 0 : i32
    return %arg1, %c0_i32, %c0_i32_0 : i32, i32, i32
  }
  func.func @transform_12(%arg0: i32, %arg1: i32) -> (i32, i32, i32) {
    %c0_i32 = arith.constant 0 : i32
    %c0_i32_0 = arith.constant 0 : i32
    %c0_i32_1 = arith.constant 0 : i32
    return %arg1, %c0_i32, %c0_i32_0 : i32, i32, i32
  }
  func.func @transform_13(%arg0: i32, %arg1: i32) -> (i32, i32, i32) {
    %c0_i32 = arith.constant 0 : i32
    %c0_i32_0 = arith.constant 0 : i32
    %c0_i32_1 = arith.constant 0 : i32
    return %arg1, %c0_i32, %c0_i32_0 : i32, i32, i32
  }
  func.func @transform_14(%arg0: i32, %arg1: i32) -> (i32, i32, i32) {
    %c0_i32 = arith.constant 0 : i32
    %c0_i32_0 = arith.constant 0 : i32
    %c0_i32_1 = arith.constant 0 : i32
    return %arg1, %c0_i32, %c0_i32_0 : i32, i32, i32
  }
  func.func @transform_15(%arg0: i32, %arg1: i32) -> (i32, i32, i32) {
    %c0_i32 = arith.constant 0 : i32
    %c0_i32_0 = arith.constant 0 : i32
    %c0_i32_1 = arith.constant 0 : i32
    return %arg1, %c0_i32, %c0_i32_0 : i32, i32, i32
  }
  func.func @transform_16(%arg0: i32, %arg1: i32) -> (i32, i32, i32) {
    %c0_i32 = arith.constant 0 : i32
    %c0_i32_0 = arith.constant 0 : i32
    %c0_i32_1 = arith.constant 0 : i32
    %c0_i32_2 = arith.constant 0 : i32
    return %c0_i32, %c0_i32_0, %c0_i32_1 : i32, i32, i32
  }
  func.func @transform_17(%arg0: i32, %arg1: i32) -> (i32, i32, i32) {
    %c0_i32 = arith.constant 0 : i32
    %c0_i32_0 = arith.constant 0 : i32
    %c0_i32_1 = arith.constant 0 : i32
    %c0_i32_2 = arith.constant 0 : i32
    return %c0_i32, %c0_i32_0, %c0_i32_1 : i32, i32, i32
  }
  func.func @transform_18(%arg0: i32, %arg1: i32) -> (i32, i32, i32) {
    %c0_i32 = arith.constant 0 : i32
    %c0_i32_0 = arith.constant 0 : i32
    %c0_i32_1 = arith.constant 0 : i32
    return %arg0, %c0_i32, %c0_i32_0 : i32, i32, i32
  }
}

</mosaic_0001>

<bundles_post_ra>
// kernel: tpu_custom_call.1
= control target key start
LH: loop header
LB: loop body
LE: loop exit
PB: predicated region body
PF: predicated region fallthrough
CT: control target
= control target key end

     0   :  { %s4547_s0 = inlined_call_operand.hbm [shape: f32[2,8,16], index: 0, kind: input, shape index: {}]   ;;  %s4548_s1 = inlined_call_operand.vmem [shape: f32[2,1,8], index: 1, kind: input, shape index: {}]   ;;  %s4549_s2 = inlined_call_operand.hbm [shape: f32[1,8,128], index: 2, kind: input, shape index: {}]   ;;  %s4550_s3 = inlined_call_operand.vmem [shape: bf16[16,128], index: 3, kind: input, shape index: {}]   ;;  %s4551_s4 = inlined_call_operand.hbm [shape: bf16[2,128,128], index: 4, kind: input, shape index: {}]   ;;  %s4552_s5 = inlined_call_operand.hbm [shape: bf16[2,128,128], index: 5, kind: input, shape index: {}]   ;;  %s4553_s6 = inlined_call_operand.hbm [shape: bf16[2,128,128], index: 6, kind: input, shape index: {}]   ;;  %s4554_s7 = inlined_call_operand.hbm [shape: bf16[2,128,128], index: 7, kind: input, shape index: {}]   ;;  %s4555_s8 = inlined_call_operand.vmem [shape: f32[2,1,128], index: 8, kind: input, shape index: {}]   ;;  %s4556_s9 = inlined_call_operand.vmem [shape: f32[2,1,128], index: 9, kind: input, shape index: {}]   ;;  %s4557_s10 = inlined_call_operand.vmem [shape: f32[2,1,128], index: 10, kind: input, shape index: {}]   ;;  %s4558_s11 = inlined_call_operand.vmem [shape: f32[2,1,128], index: 11, kind: input, shape index: {}]   ;;  %s4559_s12 = inlined_call_operand.hbm [shape: bf16[2,128,256], index: 12, kind: input, shape index: {}]   ;;  %s4560_s13 = inlined_call_operand.vmem [shape: f32[2,1,256], index: 13, kind: input, shape index: {}]   ;;  %s4561_s14 = inlined_call_operand.hbm [shape: bf16[2,256,128], index: 14, kind: input, shape index: {}]   ;;  %s4562_s15 = inlined_call_operand.vmem [shape: f32[2,1,128], index: 15, kind: input, shape index: {}]   ;;  %s4563_s16 = inlined_call_operand.vmem [shape: f32[1,1,128], index: 16, kind: input, shape index: {}]   ;;  %s4564_s17 = inlined_call_operand.vmem [shape: f32[1,1,128], index: 17, kind: input, shape index: {}]   ;;  %s4565_s18 = inlined_call_operand.hbm [shape: f32[2,8,128], index: 18, kind: output, shape index: {}]  }
   0x1   :  { %4598 = sst [smem:[#allocation33_spill]] %s4547_s0 }
   0x2   :  { %4599 = sst [smem:[#allocation34_spill]] %s4548_s1 }
   0x3   :  { %4600 = sst [smem:[#allocation35_spill]] %s4549_s2 }
   0x4   :  { %4601 = sst [smem:[#allocation36_spill]] %s4550_s3 }
   0x5   :  { %4602 = sst [smem:[#allocation37_spill]] %s4551_s4 }
   0x6   :  { %4603 = sst [smem:[#allocation38_spill]] %s4552_s5 }
   0x7   :  { %4604 = sst [smem:[#allocation39_spill]] %s4553_s6 }
   0x8   :  { %4605 = sst [smem:[#allocation40_spill]] %s4554_s7 }
   0x9   :  { %4606 = sst [smem:[#allocation41_spill]] %s4555_s8 }
   0xa   :  { %4607 = sst [smem:[#allocation42_spill]] %s4556_s9 }
   0xb   :  { %4608 = sst [smem:[#allocation43_spill]] %s4557_s10 }
   0xc   :  { %4609 = sst [smem:[#allocation44_spill]] %s4558_s11 }
   0xd   :  { %4610 = sst [smem:[#allocation45_spill]] %s4559_s12 }
   0xe   :  { %4611 = sst [smem:[#allocation46_spill]] %s4560_s13 }
   0xf   :  { %4612 = sst [smem:[#allocation47_spill]] %s4561_s14 }
  0x10   :  { %4613 = sst [smem:[#allocation48_spill]] %s4562_s15 }
  0x11   :  { %4614 = sst [smem:[#allocation49_spill]] %s4563_s16 }
  0x12   :  { %4615 = sst [smem:[#allocation50_spill]] %s4564_s17 }
  0x13   :  { %4616 = sst [smem:[#allocation51_spill]] %s4565_s18 }
  0x14   :  { %23 = vsyncpa [#allocation4], 0 }
  0x15   :  { %25 = vsyncpa [#allocation4 + $0x1], 0 }
  0x16   :  { %26 = vsyncpa [#allocation7], 0 }
  0x17   :  { %27 = vsyncpa [#allocation5], 0 }
  0x18   :  { %29 = vsyncpa [#allocation5 + $0x1], 0  ;;  %s3704_s27 = smov 0   ;;  %s3706_s28 = smov 0  }
  0x19   :  { %s3708_s29 = smov 0   ;;  %s3710_s30 = smov 0  }
  0x1a   :  { %s3712_s0 = smov 0   ;;  %s3714_s19 = smov 0  }
  0x1b   :  { %s3716_s1 = smov 0   ;;  %s3718_s20 = smov 0  }
  0x1c   :  { %s3720_s21 = smov 0   ;;  %s3722_s22 = smov 0  }
  0x1d   :  { %s3724_s2 = smov 0  }
  0x1e LB: > { %4617 = sst [smem:[#allocation19_spill]] %s3550_s28  ;;  %s44_s23 = sadd.s32 1, %s3578_s21  ;;  %s3586_s2 = sphi %s3724_s2, %s35_s2   ;;  %s3582_s22 = sphi %s3722_s22, %s4697_s22   ;;  %s3578_s21 = sphi %s3720_s21, %s4696_s21   ;;  %s3574_s20 = sphi %s3718_s20, %s4695_s20   ;;  %s3570_s1 = sphi %s3716_s1, %s4694_s1   ;;  %s3566_s19 = sphi %s3714_s19, %s4693_s19   ;;  %s3562_s0 = sphi %s3712_s0, %s4699_s0   ;;  %s3558_s30 = sphi %s3710_s30, %s4698_s30   ;;  %s3554_s29 = sphi %s3708_s29, %s4691_s29   ;;  %s3550_s28 = sphi %s3706_s28, %s4690_s28   ;;  %s3546_s27 = sphi %s3704_s27, %s4689_s27  }
  0x1f   : > { %4618 = sst [smem:[#allocation20_spill]] %s3554_s29  ;;  %s47_s24 = sadd.s32 1, %s3582_s22 }
  0x20   : > { %4619 = sst [smem:[#allocation21_spill]] %s3558_s30  ;;  %p45_p0 = scmp.ge.s32.totalorder %s44_s23, 2 }
  0x21   : > { %4620 = sst [smem:[#allocation22_spill]] %s3566_s19  ;;  %s54_s25 = sadd.s32 1, %s3566_s19 }
  0x22   : > { %4621 = sst [smem:[#allocation23_spill]] %s3570_s1  ;;  %p4573_p1 = scmp.ne.s32.totalorder %s3566_s19, %s3562_s0 }
  0x23   : > { %4622 = sst [smem:[#allocation24_spill]] %s3578_s21  ;;  %p62_p2 = scmp.eq.s32.totalorder %s3586_s2, 0 }
  0x24   : > { %4623 = sst [smem:[#allocation25_spill]] %s3582_s22  ;;  %s4701_s23 = smov (%p45_p0, %s44_s23), 0 }
  0x25   : > { %4624 = sst [smem:[#allocation26_spill]] %s3586_s2  ;;  %s4703_s24 = smov (!%p45_p0, %s47_s24), %s3582_s22 }
  0x26   : > { %4625 = sst [smem:[#allocation27_spill]] %s4701_s23  ;;  %p3771_p3 = por %p62_p2, %p4573_p1 }
  0x27   : > { %s145_s18 = ssub.s32 %s3578_s21, %s4701_s23  ;;  %p49_p4 = scmp.ge.s32.totalorder %s4703_s24, 2 }
  0x28   : > { %p146_p5 = scmp.eq.s32.totalorder %s145_s18, 0  ;;  %s148_s17 = sadd.s32 1, %s3554_s29 }
  0x29   : > { %p155_p6 = scmp.ne.s32.totalorder %s3554_s29, %s3550_s28  ;;  %s4705_s24 = smov (%p49_p4, %s4703_s24), 0 }
  0x2a   : > { %4627 = sst [smem:[#allocation28_spill]] %s4705_s24  ;;  %s51_s3 = ssub.s32 %s3582_s22, %s4705_s24 }
  0x2b   : > { %s3783_s16 = scalar_select %p146_p5, %s3554_s29, %s148_s17  }
  0x2c   : > { %p3787_p7 = por %p155_p6, %p62_p2  ;;  %p52_p8 = scmp.eq.s32.totalorder %s51_s3, 0 }
  0x2d   : > { %4628 = sst [smem:[#allocation29_spill]] %s3783_s16  ;;  %p3013_p9 = scmp.lt.s32.totalorder %s3586_s2, 4 }
  0x2e   : > { %s559_s23 = sand.u32 1, %s3586_s2   ;;  %s561_s18 = sand.u32 1, %s3566_s19  }
  0x2f   : > { %s3794_s15 = scalar_select %p52_p8, %s3566_s19, %s54_s25  }
  0x30   : > { %s2628_s11 = sshll.u32 %s561_s18, 3  ;;  %s2629_s10 = sshll.u32 %s3582_s22, 7 }
  0x31   : > { %4630 = sst [smem:[#allocation30_spill]] %s3794_s15  ;;  %s4631_s1 = sld [smem:[#allocation33_spill]] }
  0x32   : > { %s563_s24 = scalar_lea.vmem [#allocation3], %s2628_s11  ;;  %p3805_p10 = pnand %p3013_p9, %p3771_p3 }
  0x33   : > { %s570_s16 = sshll.u32 %s563_s24, 4  ;;  %p3813_p11 = pnand %p3013_p9, %p3787_p7  ;;  %s3809_s16 = int_to_ptr.vmem [resolvable:$true] %s570_s16 }
  0x34   : > { %s4574_s9 = sand.u32 1, %s3554_s29   ;;  %p3220_p13 = pneg %p3805_p10 }
  0x35   : > { %s4634_s8 = scalar_select %p3813_p11, 1, 0 }
  0x37   : > { %s4632_s14 = smov %s4631_s1  ;;  %s3801_s17 = scalar_lea.hbm %s4631_s1, %s2629_s10 }
  0x38   : > { %s3818_s10 = scalar_lea.sflag [#allocation4], %s559_s23  ;;  %s3218_s11 = scalar_lea.hbm %s3801_s17, 128 }
  0x39   : > { %p3219_p12 = scmp.ne.s32.totalorder %s3801_s17, %s3218_s11  ;;  %s3223_s25 = scalar_lea.hbm %s4632_s14, 256 }
  0x3a   : > { %p3224_p3 = scmp.lt.u32.totalorder %s3801_s17, %s4632_s14  ;;  %p3225_p4 = scmp.lt.u32.totalorder %s3223_s25, %s3218_s11 }
  0x3b   : > { %p3221_p0 = pnand %p3220_p13, %p3219_p12  ;;  %p3227_p6 = scmp.lt.u32.totalorder %s3218_s11, %s3801_s17 }
  0x3c   : > { %p3226_p5 = por %p3225_p4, %p3224_p3 }
  0x3d   : > { %p3222_p2 = pneg %p3221_p0 }
  0x3e   : > { %p3228_p7 = por %p3227_p6, %p3226_p5 }
  0x40   : > { %p3229_p8 = pnand %p3228_p7, %p3222_p2 }
  0x42   : > { %3232 = shalt.err (!%p3229_p8)
}
  0x43   : > { %s3233_s23 = scalar_lea.vmem %s3809_s16, 128  ;;  %s3588_s18 = smov [#allocation3]  }
  0x44   : > { %p3234_p9 = scmp.ne.s32.totalorder %s3809_s16, %s3233_s23  ;;  %s3238_s1 = sshll.u32 %s3588_s18, 4  ;;  %s3239_s1 = int_to_ptr.vmem [resolvable:$false] %s3238_s1 }
  0x45   : > { %s3240_s24 = scalar_lea.vmem %s3239_s1, 256  ;;  %p3241_p1 = scmp.lt.s32.totalorder %s3809_s16, %s3239_s1 }
  0x46   : > { %p3236_p12 = pnand %p3234_p9, %p3220_p13  ;;  %p3242_p3 = scmp.lt.s32.totalorder %s3240_s24, %s3233_s23 }
  0x48   : > { %p3237_p0 = pneg %p3236_p12  ;;  %p3243_p4 = por %p3242_p3, %p3241_p1 }
  0x4a   : > { %p3244_p5 = pnand %p3243_p4, %p3237_p0 }
  0x4c   : > { %3247 = shalt.err (!%p3244_p5)
}
  0x4d   : > { %2989 = dma.hbm_to_vmem [thread:$0]  (!%p3805_p10), %s3801_s17, 128, %s3809_s16, %s3818_s10  }
  0x4e   : > { %s3848_s11 = sshll.u32 %s4574_s9, 6  ;;  %s3851_s25 = sshll.u32 %s3578_s21, 10 }
  0x4f   : > { %s4635_s4 = sld [smem:[#allocation37_spill]]  ;;  %s587_s3 = scalar_lea.vmem [#allocation8], %s3848_s11 }
  0x50   : > { %s594_s18 = sshll.u32 %s587_s3, 4  ;;  %p3866_p10 = pneg %p3813_p11  ;;  %s3860_s18 = int_to_ptr.vmem [resolvable:$true] %s594_s18 }
  0x55   : > { %s3857_s23 = scalar_lea.hbm %s4635_s4, %s3851_s25  ;;  %s3253_s13 = scalar_lea.hbm %s4635_s4, 2048 }
  0x56   : > { %s3248_s16 = scalar_lea.hbm %s3857_s23, 1024  ;;  %p3254_p6 = scmp.lt.u32.totalorder %s3857_s23, %s4635_s4 }
  0x57   : > { %p3249_p1 = scmp.ne.s32.totalorder %s3857_s23, %s3248_s16  ;;  %p3255_p7 = scmp.lt.u32.totalorder %s3253_s13, %s3248_s16 }
  0x58   : > { %p3257_p9 = scmp.lt.u32.totalorder %s3248_s16, %s3857_s23 }
  0x59   : > { %p3251_p13 = pnand %p3866_p10, %p3249_p1  ;;  %p3256_p8 = por %p3255_p7, %p3254_p6 }
  0x5b   : > { %p3252_p2 = pneg %p3251_p13  ;;  %p3258_p12 = por %p3257_p9, %p3256_p8 }
  0x5d   : > { %p3259_p0 = pnand %p3258_p12, %p3252_p2 }
  0x5f   : > { %3262 = shalt.err (!%p3259_p0)
}
  0x60   : > { %s3263_s3 = scalar_lea.vmem %s3860_s18, 1024  ;;  %s3589_s1 = smov [#allocation8]  }
  0x61   : > { %p3264_p3 = scmp.ne.s32.totalorder %s3860_s18, %s3263_s3  ;;  %s3268_s24 = sshll.u32 %s3589_s1, 4  ;;  %s3269_s24 = int_to_ptr.vmem [resolvable:$false] %s3268_s24 }
  0x62   : > { %s3270_s9 = scalar_lea.vmem %s3269_s24, 2048  ;;  %p3271_p1 = scmp.lt.s32.totalorder %s3860_s18, %s3269_s24 }
  0x63   : > { %p3266_p4 = pnand %p3264_p3, %p3866_p10  ;;  %p3272_p13 = scmp.lt.s32.totalorder %s3270_s9, %s3263_s3 }
  0x65   : > { %p3267_p5 = pneg %p3266_p4  ;;  %p3273_p6 = por %p3272_p13, %p3271_p1 }
  0x67   : > { %p3274_p7 = pnand %p3273_p6, %p3267_p5 }
  0x69   : > { %3277 = shalt.err (!%p3274_p7)
}
  0x6a   : > { %s4577_s16 = smov 64   ;;  %s4578_s13 = smov 4  }
  0x6b   : > { %2992 = dma.hbm_to_vmem [thread:$0]  (!%p3813_p11), %s3857_s23, 1024, %s3860_s18, %s3818_s10, %s4577_s16, %s4577_s16, %s4578_s13  }
  0x6c   : > { %s4637_s5 = sld [smem:[#allocation38_spill]]  ;;  %s608_s24 = scalar_lea.vmem [#allocation9], %s3848_s11 }
  0x6d   : > { %s615_s9 = sshll.u32 %s608_s24, 4  ;;  %s3900_s9 = int_to_ptr.vmem [resolvable:$true] %s615_s9 }
  0x72   : > { %s3897_s3 = scalar_lea.hbm %s4637_s5, %s3851_s25  ;;  %s3283_s18 = scalar_lea.hbm %s4637_s5, 2048 }
  0x73   : > { %s3278_s4 = scalar_lea.hbm %s3897_s3, 1024  ;;  %p3284_p12 = scmp.lt.u32.totalorder %s3897_s3, %s4637_s5 }
  0x74   : > { %p3279_p2 = scmp.ne.s32.totalorder %s3897_s3, %s3278_s4  ;;  %p3285_p0 = scmp.lt.u32.totalorder %s3283_s18, %s3278_s4 }
  0x75   : > { %p3287_p4 = scmp.lt.u32.totalorder %s3278_s4, %s3897_s3 }
  0x76   : > { %p3281_p8 = pnand %p3279_p2, %p3866_p10  ;;  %p3286_p3 = por %p3285_p0, %p3284_p12 }
  0x78   : > { %p3282_p9 = pneg %p3281_p8  ;;  %p3288_p5 = por %p3287_p4, %p3286_p3 }
  0x7a   : > { %p3289_p1 = pnand %p3288_p5, %p3282_p9 }
  0x7c   : > { %3292 = shalt.err (!%p3289_p1)
}
  0x7d   : > { %s3293_s24 = scalar_lea.vmem %s3900_s9, 1024  ;;  %s3592_s14 = smov [#allocation9]  }
  0x7e   : > { %p3294_p13 = scmp.ne.s32.totalorder %s3900_s9, %s3293_s24  ;;  %s3298_s23 = sshll.u32 %s3592_s14, 4  ;;  %s3299_s23 = int_to_ptr.vmem [resolvable:$false] %s3298_s23 }
  0x7f   : > { %s3300_s26 = scalar_lea.vmem %s3299_s23, 2048  ;;  %p3301_p2 = scmp.lt.s32.totalorder %s3900_s9, %s3299_s23 }
  0x80   : > { %p3296_p6 = pnand %p3294_p13, %p3866_p10  ;;  %p3302_p8 = scmp.lt.s32.totalorder %s3300_s26, %s3293_s24 }
  0x82   : > { %p3297_p7 = pneg %p3296_p6  ;;  %p3303_p12 = por %p3302_p8, %p3301_p2 }
  0x84   : > { %p3304_p0 = pnand %p3303_p12, %p3297_p7 }
  0x86   : > { %3307 = shalt.err (!%p3304_p0)
}
  0x87   : > { %2995 = dma.hbm_to_vmem [thread:$0]  (!%p3813_p11), %s3897_s3, 1024, %s3900_s9, %s3818_s10, %s4577_s16, %s4577_s16, %s4578_s13  }
  0x88   : > { %s4638_s6 = sld [smem:[#allocation39_spill]]  ;;  %s629_s24 = scalar_lea.vmem [#allocation10], %s3848_s11 }
  0x89   : > { %s636_s14 = sshll.u32 %s629_s24, 4  ;;  %s3934_s14 = int_to_ptr.vmem [resolvable:$true] %s636_s14 }
  0x8e   : > { %s3931_s1 = scalar_lea.hbm %s4638_s6, %s3851_s25  ;;  %s3313_s9 = scalar_lea.hbm %s4638_s6, 2048 }
  0x8f   : > { %s3308_s23 = scalar_lea.hbm %s3931_s1, 1024  ;;  %p3314_p5 = scmp.lt.u32.totalorder %s3931_s1, %s4638_s6 }
  0x90   : > { %p3309_p9 = scmp.ne.s32.totalorder %s3931_s1, %s3308_s23  ;;  %p3315_p1 = scmp.lt.u32.totalorder %s3313_s9, %s3308_s23 }
  0x91   : > { %p3317_p6 = scmp.lt.u32.totalorder %s3308_s23, %s3931_s1 }
  0x92   : > { %p3311_p3 = pnand %p3309_p9, %p3866_p10  ;;  %p3316_p13 = por %p3315_p1, %p3314_p5 }
  0x94   : > { %p3312_p4 = pneg %p3311_p3  ;;  %p3318_p7 = por %p3317_p6, %p3316_p13 }
  0x96   : > { %p3319_p2 = pnand %p3318_p7, %p3312_p4 }
  0x98   : > { %3322 = shalt.err (!%p3319_p2)
}
  0x99   : > { %s3323_s24 = scalar_lea.vmem %s3934_s14, 1024  ;;  %s3593_s26 = smov [#allocation10]  }
  0x9a   : > { %p3324_p8 = scmp.ne.s32.totalorder %s3934_s14, %s3323_s24  ;;  %s3328_s3 = sshll.u32 %s3593_s26, 4  ;;  %s3329_s3 = int_to_ptr.vmem [resolvable:$false] %s3328_s3 }
  0x9b   : > { %s3330_s4 = scalar_lea.vmem %s3329_s3, 2048  ;;  %p3331_p9 = scmp.lt.s32.totalorder %s3934_s14, %s3329_s3 }
  0x9c   : > { %p3326_p12 = pnand %p3324_p8, %p3866_p10  ;;  %p3332_p3 = scmp.lt.s32.totalorder %s3330_s4, %s3323_s24 }
  0x9e   : > { %p3327_p0 = pneg %p3326_p12  ;;  %p3333_p5 = por %p3332_p3, %p3331_p9 }
  0xa0   : > { %p3334_p1 = pnand %p3333_p5, %p3327_p0 }
  0xa2   : > { %3337 = shalt.err (!%p3334_p1)
}
  0xa3   : > { %2998 = dma.hbm_to_vmem [thread:$0]  (!%p3813_p11), %s3931_s1, 1024, %s3934_s14, %s3818_s10, %s4577_s16, %s4577_s16, %s4578_s13  }
  0xa4   : > { %s4639_s7 = sld [smem:[#allocation40_spill]]  ;;  %s650_s24 = scalar_lea.vmem [#allocation11], %s3848_s11 }
  0xa5   : > { %s657_s26 = sshll.u32 %s650_s24, 4  ;;  %s4640_s3 = sand.u32 1, %s3554_s29   ;;  %s3968_s26 = int_to_ptr.vmem [resolvable:$true] %s657_s26 }
  0xa6   : > { %s3972_s4 = sshll.u32 %s4640_s3, 7 }
  0xaa   : > { %s3965_s18 = scalar_lea.hbm %s4639_s7, %s3851_s25  ;;  %s3343_s25 = scalar_lea.hbm %s4639_s7, 2048 }
  0xab   : > { %s3338_s5 = scalar_lea.hbm %s3965_s18, 1024  ;;  %p3344_p7 = scmp.lt.u32.totalorder %s3965_s18, %s4639_s7 }
  0xac   : > { %p3339_p4 = scmp.ne.s32.totalorder %s3965_s18, %s3338_s5  ;;  %p3345_p2 = scmp.lt.u32.totalorder %s3343_s25, %s3338_s5 }
  0xad   : > { %p3347_p12 = scmp.lt.u32.totalorder %s3338_s5, %s3965_s18 }
  0xae   : > { %p3341_p13 = pnand %p3339_p4, %p3866_p10  ;;  %p3346_p8 = por %p3345_p2, %p3344_p7 }
  0xb0   : > { %p3342_p6 = pneg %p3341_p13  ;;  %p3348_p0 = por %p3347_p12, %p3346_p8 }
  0xb2   : > { %p3349_p9 = pnand %p3348_p0, %p3342_p6 }
  0xb4   : > { %3352 = shalt.err (!%p3349_p9)
}
  0xb5   : > { %s3353_s11 = scalar_lea.vmem %s3968_s26, 1024  ;;  %s3594_s24 = smov [#allocation11]  }
  0xb6   : > { %p3354_p3 = scmp.ne.s32.totalorder %s3968_s26, %s3353_s11  ;;  %s3358_s3 = sshll.u32 %s3594_s24, 4  ;;  %s3359_s3 = int_to_ptr.vmem [resolvable:$false] %s3358_s3 }
  0xb7   : > { %s3360_s1 = scalar_lea.vmem %s3359_s3, 2048  ;;  %p3361_p4 = scmp.lt.s32.totalorder %s3968_s26, %s3359_s3 }
  0xb8   : > { %p3356_p5 = pnand %p3354_p3, %p3866_p10  ;;  %p3362_p13 = scmp.lt.s32.totalorder %s3360_s1, %s3353_s11 }
  0xba   : > { %p3357_p1 = pneg %p3356_p5  ;;  %p3363_p7 = por %p3362_p13, %p3361_p4 }
  0xbc   : > { %p3364_p2 = pnand %p3363_p7, %p3357_p1 }
  0xbe   : > { %3367 = shalt.err (!%p3364_p2)
}
  0xbf   : > { %3001 = dma.hbm_to_vmem [thread:$0]  (!%p3813_p11), %s3965_s18, 1024, %s3968_s26, %s3818_s10, %s4577_s16, %s4577_s16, %s4578_s13  }
  0xc0   : > { %s2750_s5 = sshll.u32 %s3578_s21, 11  ;;  %s4641_s12 = sld [smem:[#allocation45_spill]] }
  0xc1   : > { %s695_s9 = scalar_lea.vmem [#allocation12], %s3972_s4 }
  0xc2   : > { %s702_s11 = sshll.u32 %s695_s9, 4  ;;  %s4008_s11 = int_to_ptr.vmem [resolvable:$true] %s702_s11 }
  0xc6   : > { %s4005_s23 = scalar_lea.hbm %s4641_s12, %s2750_s5  ;;  %s3373_s3 = scalar_lea.hbm %s4641_s12, 4096 }
  0xc7   : > { %s3368_s24 = scalar_lea.hbm %s4005_s23, 2048  ;;  %p3374_p0 = scmp.lt.u32.totalorder %s4005_s23, %s4641_s12 }
  0xc8   : > { %p3369_p6 = scmp.ne.s32.totalorder %s4005_s23, %s3368_s24  ;;  %p3375_p9 = scmp.lt.u32.totalorder %s3373_s3, %s3368_s24 }
  0xc9   : > { %p3377_p5 = scmp.lt.u32.totalorder %s3368_s24, %s4005_s23 }
  0xca   : > { %p3371_p8 = pnand %p3369_p6, %p3866_p10  ;;  %p3376_p3 = por %p3375_p9, %p3374_p0 }
  0xcc   : > { %p3372_p12 = pneg %p3371_p8  ;;  %p3378_p1 = por %p3377_p5, %p3376_p3 }
  0xce   : > { %p3379_p4 = pnand %p3378_p1, %p3372_p12 }
  0xd0   : > { %3382 = shalt.err (!%p3379_p4)
}
  0xd1   : > { %s3383_s25 = scalar_lea.vmem %s4008_s11, 2048  ;;  %s3595_s9 = smov [#allocation12]  }
  0xd2   : > { %p3384_p13 = scmp.ne.s32.totalorder %s4008_s11, %s3383_s25  ;;  %s3388_s18 = sshll.u32 %s3595_s9, 4  ;;  %s3389_s18 = int_to_ptr.vmem [resolvable:$false] %s3388_s18 }
  0xd3   : > { %s3390_s26 = scalar_lea.vmem %s3389_s18, 4096  ;;  %p3391_p6 = scmp.lt.s32.totalorder %s4008_s11, %s3389_s18 }
  0xd4   : > { %p3386_p7 = pnand %p3384_p13, %p3866_p10  ;;  %p3392_p8 = scmp.lt.s32.totalorder %s3390_s26, %s3383_s25 }
  0xd6   : > { %p3387_p2 = pneg %p3386_p7  ;;  %p3393_p0 = por %p3392_p8, %p3391_p6 }
  0xd8   : > { %p3394_p9 = pnand %p3393_p0, %p3387_p2 }
  0xda   : > { %3397 = shalt.err (!%p3394_p9)
}
  0xdb   : > { %s3596_s24 = smov 128   ;;  %s3597_s3 = smov 8  }
  0xdc   : > { %3004 = dma.hbm_to_vmem [thread:$0]  (!%p3813_p11), %s4005_s23, 2048, %s4008_s11, %s3818_s10, %s3596_s24, %s3596_s24, %s3597_s3  }
  0xdd   : > { %s4033_s1 = sadd.s32 4294967295, %s3586_s2   ;;  %s2624_s14 = sadd.s32 4294967294, %s3586_s2  }
  0xde   : > { %p67_p12 = scmp.ne.s32.totalorder %s3562_s0, %s3558_s30  ;;  %p4580_p3 = scmp.eq.s32.totalorder %s4033_s1, 0 }
  0xdf   : > { %p161_p5 = scmp.ne.s32.totalorder %s3550_s28, %s3546_s27  ;;  %p513_p1 = scmp.eq.s32.totalorder %s4033_s1, 3 }
  0xe0   : > { %p519_p4 = scmp.eq.s32.totalorder %s2624_s14, 3  ;;  %p4044_p13 = por %p4580_p3, %p67_p12 }
  0xe1   : > { %p4050_p7 = por %p161_p5, %p4580_p3  ;;  %p4644_p2 = scmp.ne.s32.totalorder %s3566_s19, %s3562_s0 }
  0xe2   : > { %s4642_s25 = scalar_select %p4044_p13, 1, 0 }
  0xe3   : > { %s4643_s23 = scalar_select %p4050_p7, 1, 0 }
  0xe4   : > { %p4057_p6 = por %p513_p1, %p4644_p2  ;;  %p4061_p8 = por %p519_p4, %p67_p12 }
  0xe5   : > { %p2625_p0 = scmp.ge.s32.totalorder %s3586_s2, 1  ;;  %p526_p9 = scmp.lt.s32.totalorder %s3586_s2, 5 }
  0xe6   : > { %s4645_s11 = scalar_select %p4057_p6, 1, 0 }
  0xe7   : > { %s4647_s27 = scalar_select %p4061_p8, 1, 0 }
  0xe8   : > { %4646 = sst [smem:[#allocation31_spill]] %s4645_s11  ;;  %p4067_p11 = pnand %p2625_p0, %p526_p9 }
  0xe9   : > { %4648 = sst [smem:[#allocation32_spill]] %s4647_s27  ;;  %s3598_s18 = smov [#allocation6]  }
  0xea   : > { %s4649_s9 = scalar_select %p4067_p11, 1, 0 }
  0xeb   : > { %s539_s26 = sshll.u32 %s3598_s18, 4  ;;  %p2982_p5 = pneg %p4067_p11  ;;  %s4080_s26 = int_to_ptr.vmem [resolvable:$true] %s539_s26 }
  0xec   : > { %s4650_s14 = sld [smem:[#allocation47_spill]]  ;;  %s723_s13 = scalar_lea.vmem [#allocation13], %s3972_s4 }
  0xed   : > { %s730_s6 = sshll.u32 %s723_s13, 4  ;;  %p4085_p12 = pnand %p2982_p5, %p4580_p3  ;;  %s4089_s6 = int_to_ptr.vmem [resolvable:$true] %s730_s6 }
  0xf2   : > { %s4078_s16 = scalar_lea.hbm %s4650_s14, %s2750_s5  ;;  %s3403_s3 = scalar_lea.hbm %s4650_s14, 4096 }
  0xf3   : > { %s3398_s18 = scalar_lea.hbm %s4078_s16, 2048  ;;  %p3404_p0 = scmp.lt.u32.totalorder %s4078_s16, %s4650_s14 }
  0xf4   : > { %p3399_p1 = scmp.ne.s32.totalorder %s4078_s16, %s3398_s18  ;;  %p3405_p9 = scmp.lt.u32.totalorder %s3403_s3, %s3398_s18 }
  0xf5   : > { %p3407_p3 = scmp.lt.u32.totalorder %s3398_s18, %s4078_s16 }
  0xf6   : > { %p3401_p4 = pnand %p3399_p1, %p3866_p10  ;;  %p3406_p5 = por %p3405_p9, %p3404_p0 }
  0xf8   : > { %p3402_p2 = pneg %p3401_p4  ;;  %p3408_p8 = por %p3407_p3, %p3406_p5 }
  0xfa   : > { %p3409_p6 = pnand %p3408_p8, %p3402_p2 }
  0xfc   : > { %3412 = shalt.err (!%p3409_p6)
}
  0xfd   : > { %s3413_s13 = scalar_lea.vmem %s4089_s6, 2048  ;;  %s3599_s4 = smov [#allocation13]  }
  0xfe   : > { %p3414_p1 = scmp.ne.s32.totalorder %s4089_s6, %s3413_s13  ;;  %s3418_s5 = sshll.u32 %s3599_s4, 4  ;;  %s3419_s5 = int_to_ptr.vmem [resolvable:$false] %s3418_s5 }
  0xff   : > { %s3420_s12 = scalar_lea.vmem %s3419_s5, 4096  ;;  %p3421_p13 = scmp.lt.s32.totalorder %s4089_s6, %s3419_s5 }
 0x100   : > { %p3416_p4 = pnand %p3414_p1, %p3866_p10  ;;  %p3422_p11 = scmp.lt.s32.totalorder %s3420_s12, %s3413_s13 }
 0x102   : > { %p3417_p7 = pneg %p3416_p4  ;;  %p3423_p0 = por %p3422_p11, %p3421_p13 }
 0x104   : > { %p3424_p9 = pnand %p3423_p0, %p3417_p7 }
 0x106   : > { %3427 = shalt.err (!%p3424_p9)
}
 0x107   : > { %p4652_p3 = scmp.ne.s32.totalorder %s4634_s8, 0  ;;  %s4653_s22 = smov 4  }
 0x108   : > { %s4654_s18 = smov 64   ;;  %s4655_s3 = sld [smem:[#allocation35_spill]] }
 0x109   : > { %3007 = dma.hbm_to_vmem [thread:$0]  (!%p4652_p3), %s4078_s16, 2048, %s4089_s6, %s3818_s10, %s4654_s18, %s4654_s18, %s4653_s22  }
 0x10a   : > { %p3430_p10 = pneg %p4085_p12 }
 0x10e   : > { %s3428_s4 = scalar_lea.hbm %s4655_s3, 128 }
 0x10f   : > { %p3429_p11 = scmp.ne.s32.totalorder %s4655_s3, %s3428_s4  ;;  %p3435_p6 = scmp.lt.u32.totalorder %s3428_s4, %s4655_s3 }
 0x111   : > { %p3431_p13 = pnand %p3430_p10, %p3429_p11 }
 0x113   : > { %p3432_p7 = pneg %p3431_p13 }
 0x115   : > { %p3437_p8 = pnand %p3435_p6, %p3432_p7 }
 0x117   : > { %3440 = shalt.err (!%p3437_p8)
}
 0x118   : > { %s3441_s6 = scalar_lea.vmem %s4080_s26, 128  ;;  %p3449_p4 = scmp.lt.s32.totalorder %s4080_s26, %s4080_s26 }
 0x119   : > { %p3442_p2 = scmp.ne.s32.totalorder %s4080_s26, %s3441_s6  ;;  %p3450_p0 = scmp.lt.s32.totalorder %s3441_s6, %s3441_s6 }
 0x11b   : > { %p3444_p5 = pnand %p3442_p2, %p3430_p10  ;;  %p3451_p9 = por %p3450_p0, %p3449_p4 }
 0x11d   : > { %p3445_p1 = pneg %p3444_p5 }
 0x11f   : > { %p3452_p3 = pnand %p3451_p9, %p3445_p1 }
 0x121   : > { %3455 = shalt.err (!%p3452_p3)
}
 0x122   : > { %2985 = dma.hbm_to_vmem [thread:$0]  (!%p4085_p12), %s4655_s3, 128, %s4080_s26, [#allocation7]  }
 0x123   : > { %p4656_p11 = scmp.ne.s32.totalorder %s4649_s9, 0 }
 0x124   : > { %s750_s14 = sand.u32 (!%p4656_p11), 1, %s4033_s1   ;;  %s4586_s12 = sand.u32 (!%p4656_p11), 1, %s3562_s0  }
 0x125   : > { %748 = sbr.rel (%p4656_p11) target bundleno = 4898 (0x1322), region = 92  ;;  %s4143_s22 = sshll.u32 (!%p4656_p11), %s4586_s12, 3 }
 0x126   : > { %s751_s18 = scalar_lea.sflag (!%p4656_p11), [#allocation4], %s750_s14  ;;  %p4657_p10 = scmp.ne.s32.totalorder (!%p4656_p11), %s4642_s25, 0 }
 0x12c   : > { %3529 = dma.done.wait (%p4657_p10), %s751_s18, 128  }
 0x12d   : > { %3531 = vsyncadd (%p4657_p10), %s751_s18, 4294967168  ;;  %p4658_p12 = scmp.eq.s32.totalorder %s4033_s1, 0 }
 0x12f   : > { %3533 = dma.done.wait (%p4658_p12), [#allocation7], 128   ;;  %p4659_p13 = pmov %p4658_p12 }
 0x130   : > { %s765_s9 = sand.u32 1, %s3550_s28   ;;  %p4660_p7 = scmp.ne.s32.totalorder %s4643_s23, 0 }
 0x131   : > { %3535 = vsyncadd (%p4659_p13), [#allocation7], 4294967168  ;;  %s2651_s26 = sshll.u32 %s765_s9, 6 }
 0x132   : > { %s4155_s17 = scalar_lea.vmem [#allocation8], %s2651_s26 }
 0x133   : > { %3537 = dma.done.wait (%p4660_p7), %s751_s18, 8192  }
 0x134   : > { %3539 = vsyncadd (%p4660_p7), %s751_s18, 4294959104  ;;  %s4661_s25 = sld [smem:[#allocation23_spill]]  ;;  %s2655_s24 = sshll.u32 %s765_s9, 7 }
 0x135   : > { %p917_p6 = scmp.lt.s32.totalorder %s3574_s20, 1  ;;  %s4663_s16 = sld [smem:[#allocation41_spill]] }
 0x136   : > { %s4664_s12 = sld [smem:[#allocation42_spill]]  ;;  %s4665_s15 = sld [smem:[#allocation43_spill]] }
 0x137   : > { %s4164_s1 = scalar_select %p917_p6, %s3574_s20, 1 }
 0x138   : > { %s4666_s29 = sld [smem:[#allocation44_spill]]  ;;  %s4667_s13 = sld [smem:[#allocation48_spill]] }
 0x139   : > { %s4668_s10 = sld [smem:[#allocation46_spill]]  ;;  %s4199_s18 = scalar_lea.vmem [#allocation9], %s2651_s26 }
 0x13a   : > { %p920_p8 = scmp.lt.s32.totalorder %s4661_s25, 1  ;;  %s4203_s21 = scalar_lea.vmem [#allocation11], %s2651_s26 }
 0x13b   : > { %s4207_s3 = scalar_lea.vmem [#allocation13], %s2655_s24  ;;  %p2659_p2 = scmp.ne.s32.totalorder %s4661_s25, 0 }
 0x13c   : > { %s4167_s4 = scalar_select %p920_p8, %s4661_s25, 1 }
 0x13d   : > { %943 = sbr.rel (%p2659_p2) target bundleno = 542 (0x21e), region = 128  ;;  %s4669_s9 = sld [smem:[#allocation36_spill]] (!%p2659_p2)  ;;  %v3600_v1 = vmov (!%p2659_p2), 0.0   ;;  %vm3601_vm0 = vmmov (!%p2659_p2), 0   ;;  %vm955_vm1 = vcmask (!%p2659_p2), 130048   ;;  %v948_v4 = vld [vmem:[#allocation6] sm:$0xff] (!%p2659_p2) }
 0x13e   : > { %s922_s14 = scalar_lea.vmem %s4663_s16, %s4167_s4  ;;  %s925_s7 = scalar_lea.vmem %s4664_s12, %s4167_s4  ;;  %2828 = vmatprep.subr.bf16.mxu0 (!%p2659_p2), %v3600_v1  ;;  %2830 = vmatprep.mubr.msk.bf16.mxu0 (!%p2659_p2), %vm3601_vm0, %v3600_v1 }
 0x13f   : > { %s928_s19 = scalar_lea.vmem %s4665_s15, %s4167_s4  ;;  %s931_s28 = scalar_lea.vmem %s4666_s29, %s4167_s4 }
 0x140   : > { %s2658_s27 = sshll.u32 %s4167_s4, 1  ;;  %s938_s23 = scalar_lea.vmem %s4667_s13, %s4167_s4 }
 0x141   : > { %s4197_s16 = scalar_lea.vmem %s4668_s10, %s2658_s27  ;;  %s4201_s12 = scalar_lea.vmem [#allocation10], %s2651_s26 }
 0x142   : > { %s4205_s15 = scalar_lea.vmem [#allocation12], %s2655_s24  ;;  %s916_s29 = scalar_lea.vmem [#allocation14], %s4143_s22 }
 0x143   : > { %v3117_v0 = vld [vmem:[%s4669_s9] sm:$0xff] (!%p2659_p2)   ;;  %s4670_s11 = scalar_lea.vmem (!%p2659_p2), [#allocation3], %s4143_s22 }
 0x144   : > { %v944_v2 = vld [vmem:[%s4670_s11] sm:$0xff]  ;;  %2829 = vmatpush3.bf16.msra.mxu0 %v3117_v0 }
 0x145   : > { %v945_v3 = vpack.c.bf16 %v944_v2, %v944_v2 }
 0x147   : > { %2831 = vmatmul.mubr.msk.bf16.vlgmr.msra.gmra.mrb[0].mxu0 %vm955_vm1, %v945_v3 }
 0x21a   : > { %v993_v5 = vpop.f32.mrb[0].mxu0 }
 0x21b   : > { %v994_v6 = vadd.f32 %v993_v5, %v948_v4  ;;  %v2832_v7 = vpop.f32.mrb[1].mxu0 }
 0x21c   : > { %v996_v8 = vpop.f32.mrb[2].mxu0 }
 0x21d   : > { %999 = vst [vmem:[#allocation2] sm:$0xff] %v994_v6  ;;  %v2833_v9 = vpop.f32.mrb[3].mxu0 }
 0x21e PF: > { %v3118_v15 = vld [vmem:[%s4155_s17] sm:$0xff]   ;;  %v3602_v16 = vmov 0.0   ;;  %v3120_v18 = vld [vmem:[%s4155_s17 + $0x8] sm:$0xff]   ;;  %v3122_v20 = vld [vmem:[%s4155_s17 + $0x10] sm:$0xff]   ;;  %vm3603_vm2 = vmmov 0   ;;  %vm1359_vm5 = vcmask 261120   ;;  %v1407_v9 = vlaneseq }
 0x21f   : > { %2834 = vmatprep.subr.bf16.mxu0 %v3602_v16  ;;  %2854 = vmatprep.subr.bf16.mxu1 %v3602_v16  ;;  %v3119_v17 = vld [vmem:[%s4199_s18] sm:$0xff]   ;;  %v3121_v19 = vld [vmem:[%s4199_s18 + $0x8] sm:$0xff]   ;;  %v3123_v21 = vld [vmem:[%s4199_s18 + $0x10] sm:$0xff]   ;;  %vm1429_vm6 = vcmask 1043456   ;;  %s4673_s13 = sld [smem:[#allocation34_spill]]  ;;  %vm1413_vm9 = vcmask 64512  }
 0x220   : > { %2835 = vmatpush3.bf16.msra.mxu0 %v3118_v15  ;;  %2855 = vmatpush3.bf16.msra.mxu1 %v3119_v17  ;;  %v3124_v22 = vld [vmem:[%s4155_s17 + $0x18] sm:$0xff]   ;;  %v3126_v24 = vld [vmem:[%s4155_s17 + $0x20] sm:$0xff]   ;;  %v3128_v26 = vld [vmem:[%s4155_s17 + $0x28] sm:$0xff]   ;;  %s3607_s10 = smov 32   ;;  %vm1822_vm10 = vcmask 523264   ;;  %vm1824_vm11 = vcmask 785408  }
 0x221   : > { %2836 = vmatprep.subr.bf16.mxu0 %v3602_v16  ;;  %2856 = vmatprep.subr.bf16.mxu1 %v3602_v16  ;;  %v3125_v23 = vld [vmem:[%s4199_s18 + $0x18] sm:$0xff]   ;;  %v3127_v25 = vld [vmem:[%s4199_s18 + $0x20] sm:$0xff]   ;;  %v3129_v27 = vld [vmem:[%s4199_s18 + $0x28] sm:$0xff]  }
 0x222   : > { %2850 = vmatprep.mubr.msk.bf16.mxu0 %vm3603_vm2, %v3602_v16  ;;  %2870 = vmatprep.mubr.msk.bf16.mxu1 %vm3603_vm2, %v3602_v16  ;;  %v3130_v28 = vld [vmem:[%s4155_s17 + $0x30] sm:$0xff]   ;;  %v3132_v30 = vld [vmem:[%s4155_s17 + $0x38] sm:$0xff]   ;;  %v2662_v40 = vld [vmem:[%s922_s14] ss:$0 sm:$0xff] }
 0x223   : > { %v3131_v29 = vld [vmem:[%s4199_s18 + $0x30] sm:$0xff]   ;;  %v3133_v31 = vld [vmem:[%s4199_s18 + $0x38] sm:$0xff]   ;;  %v2663_v43 = vld [vmem:[%s925_s7] ss:$0 sm:$0xff]  ;;  %s3604_s7 = smov 96  }
 0x224   : > { %v4216_v10 = vld [vmem:[#allocation2] sm:$0xff]  ;;  %2837 = vmatpush3.bf16.msra.mxu0 %v3120_v18  ;;  %2857 = vmatpush3.bf16.msra.mxu1 %v3121_v19  ;;  %v3135_v48 = vld [vmem:[%s4201_s12 + $0x8] sm:$0xff]   ;;  %v3136_v49 = vld [vmem:[%s4201_s12 + $0x10] sm:$0xff]  }
 0x225   : > { %1009 = vadd.xlane.f32.xlu0 %v4216_v10  ;;  %2838 = vmatprep.subr.bf16.mxu0 %v3602_v16  ;;  %v3134_v46 = vld [vmem:[%s4201_s12] sm:$0xff]   ;;  %v3137_v50 = vld [vmem:[%s4201_s12 + $0x18] sm:$0xff]   ;;  %v3139_v52 = vld [vmem:[%s4201_s12 + $0x28] sm:$0xff]   ;;  %s4674_s6 = scalar_lea.vmem %s4673_s13, %s4164_s1  ;;  %s3606_s1 = smov 64  }
 0x226   : > { %2858 = vmatprep.subr.bf16.mxu1 %v3602_v16  ;;  %v3138_v51 = vld [vmem:[%s4201_s12 + $0x20] sm:$0xff]   ;;  %v3140_v53 = vld [vmem:[%s4201_s12 + $0x30] sm:$0xff]   ;;  %v3141_v54 = vld [vmem:[%s4201_s12 + $0x38] sm:$0xff]  }
 0x228   : > { %2839 = vmatpush3.bf16.msra.mxu0 %v3122_v20  ;;  %2859 = vmatpush3.bf16.msra.mxu1 %v3123_v21 }
 0x229   : > { %2840 = vmatprep.subr.bf16.mxu0 %v3602_v16  ;;  %2860 = vmatprep.subr.bf16.mxu1 %v3602_v16 }
 0x22c   : > { %2841 = vmatpush3.bf16.msra.mxu0 %v3124_v22  ;;  %2861 = vmatpush3.bf16.msra.mxu1 %v3125_v23 }
 0x22d   : > { %2842 = vmatprep.subr.bf16.mxu0 %v3602_v16  ;;  %2862 = vmatprep.subr.bf16.mxu1 %v3602_v16 }
 0x230   : > { %2843 = vmatpush3.bf16.msra.mxu0 %v3126_v24  ;;  %2863 = vmatpush3.bf16.msra.mxu1 %v3127_v25 }
 0x231   : > { %2844 = vmatprep.subr.bf16.mxu0 %v3602_v16  ;;  %2864 = vmatprep.subr.bf16.mxu1 %v3602_v16 }
 0x234   : > { %2845 = vmatpush3.bf16.msra.mxu0 %v3128_v26  ;;  %2865 = vmatpush3.bf16.msra.mxu1 %v3129_v27 }
 0x235   : > { %2846 = vmatprep.subr.bf16.mxu0 %v3602_v16  ;;  %2866 = vmatprep.subr.bf16.mxu1 %v3602_v16 }
 0x238   : > { %2847 = vmatpush3.bf16.msra.mxu0 %v3130_v28  ;;  %2867 = vmatpush3.bf16.msra.mxu1 %v3131_v29 }
 0x239   : > { %2848 = vmatprep.subr.bf16.mxu0 %v3602_v16  ;;  %2868 = vmatprep.subr.bf16.mxu1 %v3602_v16 }
 0x23c   : > { %2849 = vmatpush3.bf16.msra.mxu0 %v3132_v30  ;;  %2869 = vmatpush3.bf16.msra.mxu1 %v3133_v31 }
 0x23d   : > { %2874 = vmatprep.subr.bf16.mxu0 %v3602_v16  ;;  %2894 = vmatprep.subr.bf16.mxu1 %v3602_v16 }
 0x2b2   : > { %v1010_v11 = vpop.xlane.xlu0 %1009 }
 0x2b3   : > { %v1012_v12 = vmul.f32 0.0078125, %v1010_v11  ;;  %v1001_v11 = vld [vmem:[%s4674_s6] sm:$0x1] }
 0x2b4   : > { %vm1002_vm7 = vcmp.gt.f32.partialorder %v1001_v11, 0.5 }
 0x2b5   : > { %v4220_v13 = vsub.f32 %v4216_v10, %v1012_v12  ;;  %v4318_v12 = vshrl.u32 %v1407_v9, 7 }
 0x2b7   : > { %v1014_v14 = vmul.f32 %v4220_v13, %v4220_v13  ;;  %v1033_v41 = vmul.f32 %v2662_v40, %v4220_v13  ;;  %v1409_v13 = vsub.s32 0, %v4318_v12 }
 0x2b9   : > { %1015 = vadd.xlane.f32.xlu0 %v1014_v14  ;;  %v3605_v14 = vmov 0  }
 0x2ba   : > { %v1406_v15 = vsel %vm1002_vm7, 1, %v3605_v14 }
 0x2bb   : > { %v4324_v17 = vrot.slane %v1406_v15, %v1409_v13 }
 0x2bd   : > { %vm1411_vm8 = vcmp.eq.s32.totalorder %v4324_v17, 1 }
 0x346   : > { %v1016_v32 = vpop.xlane.xlu0 %1015 }
 0x347   : > { %v1017_v33 = vmul.f32 0.007874016, %v1016_v32 }
 0x349   : > { %3190 = vrsqrt.f32 %v1017_v33  ;;  %vm1020_vm3 = vcmp.eq.f32.partialorder %v1017_v33, inf  ;;  %v1023_v36 = vand.u32 2147483648, %v1017_v33  ;;  %vm1022_vm4 = vcmp.eq.f32.partialorder %v1017_v33, 0.0 }
 0x353   : > { %v3191_v34 = vpop.eup %3190 }
 0x354   : > { %v1019_v35 = vmul.f32 %v3191_v34, %v1017_v33 }
 0x356   : > { %v1021_v37 = vsel %vm1020_vm3, %v1017_v33, %v1019_v35 }
 0x357   : > { %v1024_v38 = vsel %vm1022_vm4, %v1023_v36, %v1021_v37 }
 0x358   : > { %v1025_v39 = vadd.f32 1e-06, %v1024_v38 }
 0x35a   : > { %3192 = vrcp.f32 %v1025_v39 }
 0x364   : > { %v3193_v42 = vpop.eup %3192 }
 0x365   : > { %v1034_v44 = vmul.f32 %v3193_v42, %v1033_v41 }
 0x367   : > { %v1041_v45 = vadd.f32 %v2663_v43, %v1034_v44 }
 0x369   : > { %v1042_v47 = vpack.c.bf16 %v1041_v45, %v1041_v45 }
 0x36b   : > { %2851 = vmatmul.mubr.bf16.vlgmr.msra.gmra.mrb[0].mxu0 %v1042_v47  ;;  %2871 = vmatmul.mubr.bf16.vlgmr.msra.gmra.mrb[0].mxu1 %v1042_v47 }
 0x36c   : > { %2875 = vmatpush3.bf16.msra.mxu0 %v3134_v46  ;;  %2890 = vmatprep.mubr.msk.bf16.mxu0 %vm3603_vm2, %v3602_v16 }
 0x36d   : > { %2876 = vmatprep.subr.bf16.mxu0 %v3602_v16  ;;  %2896 = vmatprep.mubr.msk.bf16.mxu1 %vm3603_vm2, %v3602_v16 }
 0x370   : > { %2877 = vmatpush3.bf16.msra.mxu0 %v3135_v48 }
 0x371   : > { %2878 = vmatprep.subr.bf16.mxu0 %v3602_v16 }
 0x374   : > { %2879 = vmatpush3.bf16.msra.mxu0 %v3136_v49 }
 0x375   : > { %2880 = vmatprep.subr.bf16.mxu0 %v3602_v16 }
 0x378   : > { %2881 = vmatpush3.bf16.msra.mxu0 %v3137_v50 }
 0x379   : > { %2882 = vmatprep.subr.bf16.mxu0 %v3602_v16 }
 0x37c   : > { %2883 = vmatpush3.bf16.msra.mxu0 %v3138_v51 }
 0x37d   : > { %2884 = vmatprep.subr.bf16.mxu0 %v3602_v16 }
 0x380   : > { %2885 = vmatpush3.bf16.msra.mxu0 %v3139_v52 }
 0x381   : > { %2886 = vmatprep.subr.bf16.mxu0 %v3602_v16 }
 0x384   : > { %2887 = vmatpush3.bf16.msra.mxu0 %v3140_v53 }
 0x385   : > { %2888 = vmatprep.subr.bf16.mxu0 %v3602_v16 }
 0x388   : > { %2889 = vmatpush3.bf16.msra.mxu0 %v3141_v54 }
 0x389   : > { %2942 = vmatprep.subr.bf16.mxu0 %v3602_v16 }
 0x38b   : > { %2891 = vmatmul.mubr.bf16.vlgmr.msra.gmra.mrb[4].mxu0 %v1042_v47 }
 0x38c   : > { %2958 = vmatprep.mubr.msk.bf16.mxu0 %vm3603_vm2, %v3602_v16 }
 0x43e   : > { %v1141_v55 = vpop.f32.mrb[0].mxu0  ;;  %v1245_v56 = vpop.f32.mrb[0].mxu1 }
 0x43f   : > { %v4295_v57 = vpack.c.bf16 %v1245_v56, %v1245_v56  ;;  %v2852_v58 = vpop.f32.mrb[1].mxu0  ;;  %v2872_v59 = vpop.f32.mrb[1].mxu1  ;;  %v1355_v1 = vmul.f32 0.17677669, %v1141_v55 }
 0x440   : > { %v1144_v60 = vpop.f32.mrb[2].mxu0  ;;  %v1248_v61 = vpop.f32.mrb[2].mxu1 }
 0x441   : > { %1477 = vrot.lane.b32.xlu0 %v4295_v57, %s3604_s7  ;;  %v2853_v62 = vpop.f32.mrb[3].mxu0  ;;  %v2873_v63 = vpop.f32.mrb[3].mxu1  ;;  %v1364_v0 = vsel %vm1359_vm5, %v4295_v57, 0  ;;  %v4302_v2 = vpack.c.bf16 %v1355_v1, %v1355_v1 }
 0x442   : > { %2895 = vmatpush3.bf16.xpose.msra.mxu1 %v1364_v0 }
 0x443   : > { %2900 = vmatprep.subr.bf16.mxu1 %v3602_v16 }
 0x449   : > { %2897 = vmatmul.mubr.msk.bf16.vlgmr.msra.gmra.mrb[4].mxu1 %vm1359_vm5, %v4302_v2 }
 0x44a   : > { %2902 = vmatprep.mubr.msk.bf16.mxu1 %vm3603_vm2, %v3602_v16 }
 0x45e   : > { %v1349_v3 = vpop.f32.mrb[4].mxu0 }
 0x45f   : > { %v4308_v4 = vpack.c.bf16 %v1349_v3, %v1349_v3  ;;  %v2892_v5 = vpop.f32.mrb[5].mxu0 }
 0x460   : > { %v1352_v6 = vpop.f32.mrb[6].mxu0 }
 0x461   : > { %v2893_v7 = vpop.f32.mrb[7].mxu0  ;;  %v1431_v8 = vsel %vm1429_vm6, %v4308_v4, 0 }
 0x462   : > { %2901 = vmatpush3.bf16.msra.mxu1 %v1431_v8 }
 0x463   : > { %2906 = vmatprep.subr.bf16.mxu1 %v3602_v16 }
 0x4b3   : > { %v1478_v32 = vpop.permute.xlu0 %1477 }
 0x4b4   : > { %v1483_v34 = vsel %vm1359_vm5, %v1478_v32, 0 }
 0x51c   : > { %v1400_v18 = vpop.f32.mrb[4].mxu1 }
 0x51d   : > { %v1412_v19 = vsel %vm1411_vm8, -1e+18, %v1400_v18  ;;  %v2898_v20 = vpop.f32.mrb[5].mxu1 }
 0x51e   : > { %v1403_v21 = vpop.f32.mrb[6].mxu1  ;;  %v1414_v22 = vsel %vm1413_vm9, %v1412_v19, -inf }
 0x51f   : > { %1415 = vmax.xlane.f32.xlu1 %v1414_v22  ;;  %v2899_v23 = vpop.f32.mrb[7].mxu1 }
 0x5ac   : > { %v1416_v24 = vpop.xlane.xlu1 %1415 }
 0x5ad   : > { %v1417_v25 = vsub.f32 %v1412_v19, %v1416_v24 }
 0x5af   : > { %v1418_v26 = vmul.f32 1.442695, %v1417_v25 }
 0x5b1   : > { %3194 = vpow2.f32 %v1418_v26 }
 0x5bb   : > { %v3195_v27 = vpop.eup %3194 }
 0x5bc   : > { %v1420_v28 = vsel %vm1413_vm9, %v3195_v27, 0.0 }
 0x5bd   : > { %1421 = vadd.xlane.f32.xlu1 %v1420_v28 }
 0x5ce   : > { %1474 = vrot.lane.b32.xlu1 %v4302_v2, %s3604_s7 }
 0x64a   : > { %v1422_v29 = vpop.xlane.xlu1 %1421 }
 0x64b   : > { %3196 = vrcp.f32 %v1422_v29 }
 0x64e   : > { %v1475_v35 = vpop.permute.xlu1 %1474 }
 0x655   : > { %v3197_v30 = vpop.eup %3196 }
 0x656   : > { %v1424_v31 = vmul.f32 %v3197_v30, %v3195_v27 }
 0x658   : > { %v1425_v33 = vpack.c.bf16 %v1424_v31, %v1424_v31 }
 0x65a   : > { %2903 = vmatmul.mubr.msk.bf16.vlgmr.msra.gmra.mrb[8].mxu1 %vm1413_vm9, %v1425_v33 }
 0x65b   : > { %2907 = vmatpush3.bf16.xpose.msra.mxu1 %v1483_v34  ;;  %2908 = vmatprep.mubr.msk.bf16.mxu1 %vm3603_vm2, %v3602_v16 }
 0x65c   : > { %2912 = vmatprep.subr.bf16.mxu1 %v3602_v16 }
 0x662   : > { %2909 = vmatmul.mubr.msk.bf16.vlgmr.msra.gmra.mrb[12].mxu1 %vm1359_vm5, %v1475_v35 }
 0x663   : > { %2914 = vmatprep.mubr.msk.bf16.mxu1 %vm3603_vm2, %v3602_v16 }
 0x72d   : > { %v4341_v36 = vpop.f32.mrb[8].mxu1 }
 0x72e   : > { %v2904_v37 = vpop.f32.mrb[9].mxu1 }
 0x72f   : > { %v1470_v38 = vpop.f32.mrb[10].mxu1 }
 0x730   : > { %v2905_v39 = vpop.f32.mrb[11].mxu1 }
 0x735   : > { %v1519_v40 = vpop.f32.mrb[12].mxu1 }
 0x736   : > { %v1525_v41 = vsel %vm1411_vm8, -1e+18, %v1519_v40  ;;  %v2910_v42 = vpop.f32.mrb[13].mxu1 }
 0x737   : > { %v1522_v43 = vpop.f32.mrb[14].mxu1  ;;  %v1526_v44 = vsel %vm1413_vm9, %v1525_v41, -inf }
 0x738   : > { %1527 = vmax.xlane.f32.xlu1 %v1526_v44  ;;  %v2911_v45 = vpop.f32.mrb[15].mxu1 }
 0x749   : > { %1589 = vrot.lane.b32.xlu1 %v4295_v57, %s3606_s1 }
 0x74d   : > { %1587 = vrot.lane.b32.xlu1 %v4302_v2, %s3606_s1 }
 0x7c5   : > { %v1528_v46 = vpop.xlane.xlu1 %1527 }
 0x7c6   : > { %v1529_v47 = vsub.f32 %v1525_v41, %v1528_v46 }
 0x7c8   : > { %v1530_v48 = vmul.f32 1.442695, %v1529_v47  ;;  %v3142_v47 = vld [vmem:[%s4203_s21] sm:$0xff]  }
 0x7c9   : > { %v1590_v56 = vpop.permute.xlu1 %1589  ;;  %2943 = vmatpush3.bf16.msra.mxu0 %v3142_v47 }
 0x7ca   : > { %3198 = vpow2.f32 %v1530_v48  ;;  %v1595_v59 = vsel %vm1359_vm5, %v1590_v56, 0  ;;  %v3143_v48 = vld [vmem:[%s4203_s21 + $0x8] sm:$0xff]   ;;  %2944 = vmatprep.subr.bf16.mxu0 %v3602_v16 }
 0x7cd   : > { %v1588_v60 = vpop.permute.xlu1 %1587  ;;  %2945 = vmatpush3.bf16.msra.mxu0 %v3143_v48 }
 0x7ce   : > { %2946 = vmatprep.subr.bf16.mxu0 %v3602_v16 }
 0x7d4   : > { %v3199_v49 = vpop.eup %3198 }
 0x7d5   : > { %v1532_v50 = vsel %vm1413_vm9, %v3199_v49, 0.0 }
 0x7d6   : > { %1533 = vadd.xlane.f32.xlu0 %v1532_v50  ;;  %v3145_v50 = vld [vmem:[%s4203_s21 + $0x18] sm:$0xff]  }
 0x7ec   : > { %1539 = vrot.lane.b32.xlu0 %v4308_v4, %s3604_s7 }
 0x863   : > { %v1534_v51 = vpop.xlane.xlu0 %1533 }
 0x864   : > { %3200 = vrcp.f32 %v1534_v51  ;;  %v3146_v51 = vld [vmem:[%s4203_s21 + $0x20] sm:$0xff]  }
 0x867   : > { %v1540_v52 = vpop.permute.xlu0 %1539 }
 0x868   : > { %v1545_v53 = vsel %vm1429_vm6, %v1540_v52, 0  ;;  %v3148_v52 = vld [vmem:[%s4203_s21 + $0x30] sm:$0xff]  }
 0x869   : > { %2913 = vmatpush3.bf16.msra.mxu1 %v1545_v53  ;;  %v3149_v53 = vld [vmem:[%s4203_s21 + $0x38] sm:$0xff]  }
 0x86a   : > { %2918 = vmatprep.subr.bf16.mxu1 %v3602_v16 }
 0x86e   : > { %v3201_v54 = vpop.eup %3200 }
 0x86f   : > { %v1536_v55 = vmul.f32 %v3201_v54, %v3199_v49  ;;  %v3144_v49 = vld [vmem:[%s4203_s21 + $0x10] sm:$0xff]  }
 0x870   : > { %2947 = vmatpush3.bf16.msra.mxu0 %v3144_v49  ;;  %v2704_v49 = vld [vmem:[%s928_s19] ss:$0 sm:$0xff] }
 0x871   : > { %v1537_v58 = vpack.c.bf16 %v1536_v55, %v1536_v55  ;;  %2948 = vmatprep.subr.bf16.mxu0 %v3602_v16 }
 0x873   : > { %2915 = vmatmul.mubr.msk.bf16.vlgmr.msra.gmra.mrb[16].mxu1 %vm1413_vm9, %v1537_v58 }
 0x874   : > { %2919 = vmatpush3.bf16.xpose.msra.mxu1 %v1595_v59  ;;  %2920 = vmatprep.mubr.msk.bf16.mxu1 %vm3603_vm2, %v3602_v16 }
 0x875   : > { %2924 = vmatprep.subr.bf16.mxu1 %v3602_v16  ;;  %2949 = vmatpush3.bf16.msra.mxu0 %v3145_v50 }
 0x876   : > { %2950 = vmatprep.subr.bf16.mxu0 %v3602_v16 }
 0x879   : > { %2951 = vmatpush3.bf16.msra.mxu0 %v3146_v51 }
 0x87a   : > { %2952 = vmatprep.subr.bf16.mxu0 %v3602_v16 }
 0x87b   : > { %2921 = vmatmul.mubr.msk.bf16.vlgmr.msra.gmra.mrb[20].mxu1 %vm1359_vm5, %v1588_v60 }
 0x87c   : > { %2926 = vmatprep.mubr.msk.bf16.mxu1 %vm3603_vm2, %v3602_v16 }
 0x946   : > { %v1581_v61 = vpop.f32.mrb[16].mxu1 }
 0x947   : > { %v2916_v62 = vpop.f32.mrb[17].mxu1 }
 0x948   : > { %v1584_v63 = vpop.f32.mrb[18].mxu1 }
 0x949   : > { %v2917_v0 = vpop.f32.mrb[19].mxu1 }
 0x94e   : > { %v1631_v1 = vpop.f32.mrb[20].mxu1 }
 0x94f   : > { %v1637_v3 = vsel %vm1411_vm8, -1e+18, %v1631_v1  ;;  %v2922_v5 = vpop.f32.mrb[21].mxu1 }
 0x950   : > { %v1634_v6 = vpop.f32.mrb[22].mxu1  ;;  %v1638_v7 = vsel %vm1413_vm9, %v1637_v3, -inf }
 0x951   : > { %1639 = vmax.xlane.f32.xlu1 %v1638_v7  ;;  %v2923_v8 = vpop.f32.mrb[23].mxu1 }
 0x962   : > { %1700 = vrot.lane.b32.xlu1 %v4295_v57, %s3607_s10 }
 0x966   : > { %1698 = vrot.lane.b32.xlu1 %v4302_v2, %s3607_s10 }
 0x9de   : > { %v1640_v9 = vpop.xlane.xlu1 %1639 }
 0x9df   : > { %v1641_v11 = vsub.f32 %v1637_v3, %v1640_v9 }
 0x9e1   : > { %v1642_v15 = vmul.f32 1.442695, %v1641_v11 }
 0x9e2   : > { %v1701_v23 = vpop.permute.xlu1 %1700 }
 0x9e3   : > { %3202 = vpow2.f32 %v1642_v15  ;;  %v1706_v25 = vsel %vm1359_vm5, %v1701_v23, 0  ;;  %v3150_v15 = vld [vmem:[%s4205_s15] ss:$8 sps:$4 sm:$0xff]   ;;  %v3164_v23 = vld [vmem:[%s4205_s15 + $0x44] ss:$8 sps:$4 sm:$0xff]  }
 0x9e6   : > { %v1699_v26 = vpop.permute.xlu1 %1698 }
 0x9ed   : > { %v3203_v18 = vpop.eup %3202 }
 0x9ee   : > { %v1644_v19 = vsel %vm1413_vm9, %v3203_v18, 0.0 }
 0x9ef   : > { %1645 = vadd.xlane.f32.xlu0 %v1644_v19  ;;  %v3153_v19 = vld [vmem:[%s4205_s15 + $0x10] ss:$8 sps:$4 sm:$0xff]  }
 0xa05   : > { %1650 = vrot.lane.b32.xlu0 %v4308_v4, %s3606_s1 }
 0xa7c   : > { %v1646_v20 = vpop.xlane.xlu0 %1645 }
 0xa7d   : > { %3204 = vrcp.f32 %v1646_v20  ;;  %v3158_v20 = vld [vmem:[%s4205_s15 + $0x24] ss:$8 sps:$4 sm:$0xff]  }
 0xa80   : > { %v1651_v21 = vpop.permute.xlu0 %1650 }
 0xa81   : > { %v1656_v22 = vsel %vm1429_vm6, %v1651_v21, 0  ;;  %v3156_v21 = vld [vmem:[%s4205_s15 + $0x20] ss:$8 sps:$4 sm:$0xff]  }
 0xa82   : > { %2925 = vmatpush3.bf16.msra.mxu1 %v1656_v22  ;;  %v3161_v22 = vld [vmem:[%s4205_s15 + $0x34] ss:$8 sps:$4 sm:$0xff]  }
 0xa83   : > { %2930 = vmatprep.subr.bf16.mxu1 %v3602_v16 }
 0xa87   : > { %v3205_v57 = vpop.eup %3204 }
 0xa88   : > { %v1648_v2 = vmul.f32 %v3205_v57, %v3203_v18  ;;  %v3155_v18 = vld [vmem:[%s4205_s15 + $0x14] ss:$8 sps:$4 sm:$0xff]   ;;  %v3159_v57 = vld [vmem:[%s4205_s15 + $0x30] ss:$8 sps:$4 sm:$0xff]  }
 0xa8a   : > { %v1649_v24 = vpack.c.bf16 %v1648_v2, %v1648_v2  ;;  %v3162_v2 = vld [vmem:[%s4205_s15 + $0x40] ss:$8 sps:$4 sm:$0xff]  }
 0xa8c   : > { %2927 = vmatmul.mubr.msk.bf16.vlgmr.msra.gmra.mrb[24].mxu1 %vm1413_vm9, %v1649_v24  ;;  %v3167_v24 = vld [vmem:[%s4205_s15 + $0x54] ss:$8 sps:$4 sm:$0xff]  }
 0xa8d   : > { %2931 = vmatpush3.bf16.xpose.msra.mxu1 %v1706_v25  ;;  %2932 = vmatprep.mubr.msk.bf16.mxu1 %vm3603_vm2, %v3602_v16  ;;  %v3165_v25 = vld [vmem:[%s4205_s15 + $0x50] ss:$8 sps:$4 sm:$0xff]  }
 0xa8e   : > { %2936 = vmatprep.subr.bf16.mxu1 %v3602_v16 }
 0xa94   : > { %2933 = vmatmul.mubr.msk.bf16.vlgmr.msra.gmra.mrb[28].mxu1 %vm1359_vm5, %v1699_v26  ;;  %v3170_v26 = vld [vmem:[%s4205_s15 + $0x64] ss:$8 sps:$4 sm:$0xff]  }
 0xa95   : > { %2938 = vmatprep.mubr.msk.bf16.mxu1 %vm3603_vm2, %v3602_v16 }
 0xb5f   : > { %v1692_v27 = vpop.f32.mrb[24].mxu1 }
 0xb60   : > { %v2928_v28 = vpop.f32.mrb[25].mxu1 }
 0xb61   : > { %v1695_v29 = vpop.f32.mrb[26].mxu1  ;;  %v3173_v28 = vld [vmem:[%s4205_s15 + $0x74] ss:$8 sps:$4 sm:$0xff]  }
 0xb62   : > { %v2929_v30 = vpop.f32.mrb[27].mxu1  ;;  %v3171_v29 = vld [vmem:[%s4205_s15 + $0x70] ss:$8 sps:$4 sm:$0xff]  }
 0xb63   : > { %v3174_v30 = vld [vmem:[%s4207_s3 + $0x40] sm:$0xff]  }
 0xb67   : > { %v1742_v31 = vpop.f32.mrb[28].mxu1 }
 0xb68   : > { %v1748_v32 = vsel %vm1411_vm8, -1e+18, %v1742_v31  ;;  %v2934_v33 = vpop.f32.mrb[29].mxu1  ;;  %v3175_v31 = vld [vmem:[%s4207_s3] sm:$0xff]  }
 0xb69   : > { %v1745_v34 = vpop.f32.mrb[30].mxu1  ;;  %v1749_v35 = vsel %vm1413_vm9, %v1748_v32, -inf  ;;  %v3177_v33 = vld [vmem:[%s4207_s3 + $0x8] sm:$0xff]  }
 0xb6a   : > { %1750 = vmax.xlane.f32.xlu0 %v1749_v35  ;;  %v2935_v37 = vpop.f32.mrb[31].mxu1  ;;  %v3178_v34 = vld [vmem:[%s4207_s3 + $0x50] sm:$0xff]  }
 0xb6b   : > { %v3179_v35 = vld [vmem:[%s4207_s3 + $0x10] sm:$0xff]   ;;  %v3180_v37 = vld [vmem:[%s4207_s3 + $0x58] sm:$0xff]  }
 0xb80   : > { %1761 = vrot.lane.b32.xlu0 %v4308_v4, %s3607_s10 }
 0xb84   : > { %1814 = vrot.lane.b32.xlu0 %v1692_v27, %s3606_s1  ;;  %v3168_v27 = vld [vmem:[%s4205_s15 + $0x60] ss:$8 sps:$4 sm:$0xff]  }
 0xbf7   : > { %v1751_v38 = vpop.xlane.xlu0 %1750 }
 0xbf8   : > { %v1752_v39 = vsub.f32 %v1748_v32, %v1751_v38  ;;  %v3176_v32 = vld [vmem:[%s4207_s3 + $0x48] sm:$0xff]   ;;  %v3181_v38 = vld [vmem:[%s4207_s3 + $0x18] sm:$0xff]  }
 0xbfa   : > { %v1753_v40 = vmul.f32 1.442695, %v1752_v39  ;;  %v3182_v39 = vld [vmem:[%s4207_s3 + $0x60] sm:$0xff]  }
 0xbfb   : > { %v1762_v41 = vpop.permute.xlu0 %1761 }
 0xbfc   : > { %3206 = vpow2.f32 %v1753_v40  ;;  %v1767_v17 = vsel %vm1429_vm6, %v1762_v41, 0  ;;  %v3183_v40 = vld [vmem:[%s4207_s3 + $0x20] sm:$0xff]   ;;  %v3184_v41 = vld [vmem:[%s4207_s3 + $0x68] sm:$0xff]  }
 0xbfd   : > { %2937 = vmatpush3.bf16.msra.mxu1 %v1767_v17  ;;  %v3185_v17 = vld [vmem:[%s4207_s3 + $0x28] sm:$0xff]  }
 0xc06   : > { %v3207_v42 = vpop.eup %3206 }
 0xc07   : > { %v1755_v43 = vsel %vm1413_vm9, %v3207_v42, 0.0 }
 0xc08   : > { %1756 = vadd.xlane.f32.xlu1 %v1755_v43 }
 0xc19   : > { %1810 = vrot.lane.b32.xlu1 %v1581_v61, %s3607_s10  ;;  %v1815_v61 = vpop.permute.xlu0 %1814 }
 0xc95   : > { %v1757_v4 = vpop.xlane.xlu1 %1756 }
 0xc96   : > { %3208 = vrcp.f32 %v1757_v4 }
 0xc99   : > { %v1811_v59 = vpop.permute.xlu1 %1810 }
 0xc9a   : > { %v1821_v60 = vsel %vm1359_vm5, %v4341_v36, %v1811_v59  ;;  %v3189_v59 = vld [vmem:[%s4207_s3 + $0x38] sm:$0xff]  }
 0xc9b   : > { %v1823_v62 = vsel %vm1822_vm10, %v1821_v60, %v1815_v61  ;;  %v1007_v60 = vld [vmem:[%s4197_s16] sm:$0x3]  ;;  %v1988_v61 = vsub.s32 1, %v4318_v12 }
 0xc9c   : > { %v2722_v12 = vld [vmem:[%s938_s23] ss:$0 sm:$0xff] }
 0xca0   : > { %v3209_v44 = vpop.eup %3208 }
 0xca1   : > { %v1759_v45 = vmul.f32 %v3209_v44, %v3207_v42 }
 0xca3   : > { %v1760_v46 = vpack.c.bf16 %v1759_v45, %v1759_v45 }
 0xca5   : > { %2939 = vmatmul.mubr.msk.bf16.vlgmr.msra.gmra.mrb[32].mxu1 %vm1413_vm9, %v1760_v46 }
 0xca6   : > { %2104 = vmatprep.mubr.bf16.mxu1 %v3605_v14  ;;  %v3147_v14 = vld [vmem:[%s4203_s21 + $0x28] sm:$0xff]  }
 0xca7   : > { %2953 = vmatpush3.bf16.msra.mxu0 %v3147_v14  ;;  %v2705_v14 = vld [vmem:[%s931_s28] ss:$0 sm:$0xff] }
 0xca8   : > { %2954 = vmatprep.subr.bf16.mxu0 %v3602_v16 }
 0xcab   : > { %2955 = vmatpush3.bf16.msra.mxu0 %v3148_v52 }
 0xcac   : > { %2956 = vmatprep.subr.bf16.mxu0 %v3602_v16 }
 0xcaf   : > { %2957 = vmatpush3.bf16.msra.mxu0 %v3149_v53 }
 0xcb0   : > { %2806 = vmatprep.subr.bf16.mxu0 %v3174_v30 }
 0xd78   : > { %v1803_v54 = vpop.f32.mrb[32].mxu1 }
 0xd79   : > { %1818 = vrot.lane.b32.xlu1 %v1803_v54, %s3604_s7  ;;  %v2940_v55 = vpop.f32.mrb[33].mxu1 }
 0xd7a   : > { %v1806_v56 = vpop.f32.mrb[34].mxu1  ;;  %v3186_v55 = vld [vmem:[%s4207_s3 + $0x70] sm:$0xff]  }
 0xd7b   : > { %v2941_v58 = vpop.f32.mrb[35].mxu1  ;;  %v3187_v56 = vld [vmem:[%s4207_s3 + $0x30] sm:$0xff]  }
 0xd7c   : > { %v3188_v58 = vld [vmem:[%s4207_s3 + $0x78] sm:$0xff]   ;;  %s4678_s3 = sld [smem:[#allocation23_spill]] }
 0xd82   : > { %p2739_p5 = scmp.ne.s32.totalorder %s4678_s3, 1 }
 0xd83   : > { %s4679_s9 = sld [smem:[#allocation49_spill]] (!%p2739_p5)  ;;  %s4680_s26 = sld [smem:[#allocation50_spill]] (!%p2739_p5) }
 0xdeb   : > { %v1819_v63 = vpop.permute.xlu1 %1818 }
 0xdec   : > { %v1825_v16 = vsel %vm1824_vm11, %v1823_v62, %v1819_v63  ;;  %v1985_v62 = vrot.slane %v1007_v60, %v1409_v13  ;;  %v1989_v63 = vrot.slane %v1007_v60, %v1988_v61 }
 0xded   : > { %v1826_v0 = vpack.c.bf16 %v1825_v16, %v1825_v16 }
 0xdef   : > { %2959 = vmatmul.mubr.bf16.vlgmr.msra.gmra.mrb[8].mxu0 %v1826_v0 }
 0xdf0   : > { %2807 = vmatpush3.bf16.msra.mxu0 %v3175_v31  ;;  %v2740_v31 = vld [vmem:[%s4679_s9] ss:$0 sm:$0xff] (!%p2739_p5) }
 0xdf1   : > { %2808 = vmatprep.subr.bf16.mxu0 %v3176_v32 }
 0xdf4   : > { %2809 = vmatpush3.bf16.msra.mxu0 %v3177_v33 }
 0xdf5   : > { %2810 = vmatprep.subr.bf16.mxu0 %v3178_v34  ;;  %v2741_v34 = vld [vmem:[%s4680_s26] ss:$0 sm:$0xff] (!%p2739_p5) }
 0xdf8   : > { %2811 = vmatpush3.bf16.msra.mxu0 %v3179_v35 }
 0xdf9   : > { %2812 = vmatprep.subr.bf16.mxu0 %v3180_v37 }
 0xdfc   : > { %2813 = vmatpush3.bf16.msra.mxu0 %v3181_v38 }
 0xdfd   : > { %2814 = vmatprep.subr.bf16.mxu0 %v3182_v39 }
 0xe00   : > { %2815 = vmatpush3.bf16.msra.mxu0 %v3183_v40 }
 0xe01   : > { %2816 = vmatprep.subr.bf16.mxu0 %v3184_v41 }
 0xe04   : > { %2817 = vmatpush3.bf16.msra.mxu0 %v3185_v17 }
 0xe05   : > { %2818 = vmatprep.subr.bf16.mxu0 %v3186_v55 }
 0xe08   : > { %2819 = vmatpush3.bf16.msra.mxu0 %v3187_v56 }
 0xe09   : > { %2820 = vmatprep.subr.bf16.mxu0 %v3188_v58 }
 0xe0c   : > { %2821 = vmatpush3.bf16.msra.mxu0 %v3189_v59 }
 0xec2   : > { %v1925_v1 = vpop.f32.mrb[8].mxu0 }
 0xec3   : > { %v4413_v3 = vadd.f32 %v1925_v1, %v4216_v10  ;;  %v2960_v5 = vpop.f32.mrb[9].mxu0  ;;  %v3152_v10 = vld [vmem:[%s4205_s15 + $0x4] ss:$8 sps:$4 sm:$0xff]  }
 0xec4   : > { %v1928_v6 = vpop.f32.mrb[10].mxu0  ;;  %2072 = vmatprep.subr.bf16.mxu1 %v3152_v10 }
 0xec5   : > { %1932 = vadd.xlane.f32.xlu0 %v4413_v3  ;;  %v2961_v36 = vpop.f32.mrb[11].mxu0  ;;  %2073 = vmatpush1.bf16.msra.mxu1 %v3150_v15 }
 0xec6   : > { %2074 = vmatprep.subr.bf16.mxu1 %v3155_v18 }
 0xec9   : > { %2075 = vmatpush1.bf16.msra.mxu1 %v3153_v19 }
 0xeca   : > { %2076 = vmatprep.subr.bf16.mxu1 %v3158_v20 }
 0xecd   : > { %2077 = vmatpush1.bf16.msra.mxu1 %v3156_v21 }
 0xece   : > { %2078 = vmatprep.subr.bf16.mxu1 %v3161_v22 }
 0xed1   : > { %2079 = vmatpush1.bf16.msra.mxu1 %v3159_v57 }
 0xed2   : > { %2080 = vmatprep.subr.bf16.mxu1 %v3164_v23 }
 0xed5   : > { %2081 = vmatpush1.bf16.msra.mxu1 %v3162_v2 }
 0xed6   : > { %2082 = vmatprep.subr.bf16.mxu1 %v3167_v24 }
 0xed9   : > { %2083 = vmatpush1.bf16.msra.mxu1 %v3165_v25 }
 0xeda   : > { %2084 = vmatprep.subr.bf16.mxu1 %v3170_v26 }
 0xedd   : > { %2085 = vmatpush1.bf16.msra.mxu1 %v3168_v27 }
 0xede   : > { %2086 = vmatprep.subr.bf16.mxu1 %v3173_v28 }
 0xee1   : > { %2087 = vmatpush1.bf16.msra.mxu1 %v3171_v29 }
 0xf52   : > { %v1933_v7 = vpop.xlane.xlu0 %1932 }
 0xf53   : > { %v1934_v8 = vmul.f32 0.0078125, %v1933_v7 }
 0xf55   : > { %v4417_v9 = vsub.f32 %v4413_v3, %v1934_v8 }
 0xf57   : > { %v1936_v11 = vmul.f32 %v4417_v9, %v4417_v9  ;;  %v1955_v50 = vmul.f32 %v2704_v49, %v4417_v9 }
 0xf59   : > { %1937 = vadd.xlane.f32.xlu1 %v1936_v11 }
 0xfe6   : > { %v1938_v42 = vpop.xlane.xlu1 %1937 }
 0xfe7   : > { %v1939_v43 = vmul.f32 0.007874016, %v1938_v42 }
 0xfe9   : > { %3210 = vrsqrt.f32 %v1939_v43  ;;  %vm1942_vm12 = vcmp.eq.f32.partialorder %v1939_v43, inf  ;;  %v1945_v45 = vand.u32 2147483648, %v1939_v43  ;;  %vm1944_vm13 = vcmp.eq.f32.partialorder %v1939_v43, 0.0 }
 0xff3   : > { %v3211_v4 = vpop.eup %3210 }
 0xff4   : > { %v1941_v44 = vmul.f32 %v3211_v4, %v1939_v43 }
 0xff6   : > { %v1943_v46 = vsel %vm1942_vm12, %v1939_v43, %v1941_v44 }
 0xff7   : > { %v1946_v47 = vsel %vm1944_vm13, %v1945_v45, %v1943_v46 }
 0xff8   : > { %v1947_v48 = vadd.f32 1e-06, %v1946_v47 }
 0xffa   : > { %3212 = vrcp.f32 %v1947_v48 }
0x1004   : > { %v3213_v51 = vpop.eup %3212 }
0x1005   : > { %v1956_v52 = vmul.f32 %v3213_v51, %v1955_v50 }
0x1007   : > { %v1963_v53 = vadd.f32 %v2705_v14, %v1956_v52 }
0x1009   : > { %v1964_v54 = vpack.c.bf16 %v1963_v53, %v1963_v53 }
0x100b   : > { %2105 = vmatmul.mubr.bf16.vlgmr.msra.gmra.mrb[36].mxu1 %v1964_v54 }
0x10de   : > { %v2106_v16 = vpop.f32.mrb[36].mxu1 }
0x10df   : > { %v2107_v0 = vadd.f32 %v2106_v16, %v1985_v62  ;;  %v2108_v1 = vpop.f32.mrb[37].mxu1 }
0x10e0   : > { %v2109_v5 = vadd.f32 %v2108_v1, %v1989_v63  ;;  %v2110_v6 = vpop.f32.mrb[38].mxu1 }
0x10e1   : > { %v2113_v36 = vmax.f32 %v2107_v0, 0.0  ;;  %v2111_v7 = vpop.f32.mrb[39].mxu1 }
0x10e2   : > { %v2114_v8 = vmax.f32 %v2109_v5, 0.0 }
0x10e3   : > { %v2115_v11 = vpack.c.bf16 %v2113_v36, %v2113_v36 }
0x10e4   : > { %v2116_v9 = vpack.c.bf16 %v2114_v8, %v2114_v8 }
0x10e6   : > { %2283 = vmatprep.mubr.bf16.mxu0 %v2116_v9 }
0x10e7   : > { %2284 = vmatmul.mubr.bf16.vlgmr.msra.gmra.mrb[12].mxu0 %v2115_v11 }
0x11ba   : > { %v2822_v10 = vpop.f32.mrb[12].mxu0 }
0x11bb   : > { %v2823_v13 = vpop.f32.mrb[13].mxu0 }
0x11bc   : > { %v2824_v15 = vadd.f32 %v2823_v13, %v2822_v10  ;;  %v2825_v18 = vpop.f32.mrb[14].mxu0  ;;  %2296 = sbr.rel (%p2739_p5) target bundleno = 4871 (0x1307), region = 132 }
0x11bd   : > { %v2826_v19 = vpop.f32.mrb[15].mxu0 }
0x11be   : > { %v2286_v20 = vadd.f32 %v2824_v15, %v2722_v12 }
0x11c0   : > { %v2291_v21 = vadd.f32 %v2286_v20, %v4413_v3 }
0x11c2   : > { %2292 = vst [vmem:[#allocation2] sm:$0xff] %v2291_v21  ;;  %2299 = vadd.xlane.f32.xlu0 (!%p2739_p5), %v2291_v21 }
0x124f   : > { %v2300_v22 = vpop.xlane.xlu0 %2299 }
0x1250   : > { %v2301_v57 = vmul.f32 0.0078125, %v2300_v22 }
0x1252   : > { %v2302_v2 = vsub.f32 %v2291_v21, %v2301_v57 }
0x1254   : > { %v2303_v23 = vmul.f32 %v2302_v2, %v2302_v2  ;;  %v2322_v32 = vmul.f32 %v2740_v31, %v2302_v2 }
0x1256   : > { %2304 = vadd.xlane.f32.xlu0 %v2303_v23 }
0x12e3   : > { %v2305_v24 = vpop.xlane.xlu0 %2304 }
0x12e4   : > { %v2306_v25 = vmul.f32 0.007874016, %v2305_v24 }
0x12e6   : > { %3214 = vrsqrt.f32 %v2306_v25  ;;  %vm2309_vm14 = vcmp.eq.f32.partialorder %v2306_v25, inf  ;;  %v2312_v28 = vand.u32 2147483648, %v2306_v25  ;;  %vm2311_vm15 = vcmp.eq.f32.partialorder %v2306_v25, 0.0 }
0x12f0   : > { %v3215_v26 = vpop.eup %3214 }
0x12f1   : > { %v2308_v27 = vmul.f32 %v3215_v26, %v2306_v25 }
0x12f3   : > { %v2310_v29 = vsel %vm2309_vm14, %v2306_v25, %v2308_v27 }
0x12f4   : > { %v2313_v3 = vsel %vm2311_vm15, %v2312_v28, %v2310_v29 }
0x12f5   : > { %v2314_v30 = vadd.f32 1e-06, %v2313_v3 }
0x12f7   : > { %3216 = vrcp.f32 %v2314_v30 }
0x1301   : > { %v3217_v33 = vpop.eup %3216 }
0x1302   : > { %v2323_v35 = vmul.f32 %v3217_v33, %v2322_v32 }
0x1304   : > { %v2330_v37 = vadd.f32 %v2741_v34, %v2323_v35 }
0x1306   : > { %2331 = vst [vmem:[%s916_s29] sm:$0xff] %v2330_v37 }
0x1307 PF: > { %s4681_s17 = sld [smem:[#allocation31_spill]]  ;;  %s2743_s25 = sshll.u32 %s3574_s20, 7 }
0x1308   : > { %s4682_s7 = sld [smem:[#allocation51_spill]]  ;;  %s2346_s8 = sshll.u32 %s916_s29, 4  ;;  %s2347_s8 = int_to_ptr.vmem [resolvable:$true] %s2346_s8 }
0x1309   : > { %s4683_s13 = sand.u32 1, %s3562_s0   ;;  %s3456_s1 = scalar_lea.vmem %s2347_s8, 128 }
0x130a   : > { %s2333_s6 = scalar_lea.sflag [#allocation5], %s4683_s13  ;;  %p3457_p1 = scmp.ne.s32.totalorder %s2347_s8, %s3456_s1 }
0x130b   : > { %s3608_s10 = smov [#allocation14]  }
0x130c   : > { %s3460_s18 = sshll.u32 %s3608_s10, 4  ;;  %s3461_s18 = int_to_ptr.vmem [resolvable:$false] %s3460_s18 }
0x130d   : > { %p4684_p4 = scmp.ne.s32.totalorder %s4681_s17, 0  ;;  %s3462_s12 = scalar_lea.vmem %s3461_s18, 256 }
0x130e   : > { %s4487_s14 = scalar_lea.hbm %s4682_s7, %s2743_s25  ;;  %p3463_p3 = scmp.lt.s32.totalorder %s2347_s8, %s3461_s18 }
0x130f   : > { %p3458_p0 = pnand %p3457_p1, %p4684_p4  ;;  %p3464_p11 = scmp.lt.s32.totalorder %s3462_s12, %s3456_s1 }
0x1311   : > { %p3459_p9 = pneg %p3458_p0  ;;  %p3465_p10 = por %p3464_p11, %p3463_p3 }
0x1313   : > { %p3466_p12 = pnand %p3465_p10, %p3459_p9 }
0x1315   : > { %3469 = shalt.err (!%p3466_p12)
}
0x1316   : > { %s3470_s20 = scalar_lea.hbm %s4487_s14, 128  ;;  %s3474_s21 = scalar_lea.hbm %s4682_s7, 256 }
0x1317   : > { %p3471_p13 = scmp.ne.s32.totalorder %s4487_s14, %s3470_s20  ;;  %p3475_p8 = scmp.lt.u32.totalorder %s4487_s14, %s4682_s7 }
0x1318   : > { %p3476_p2 = scmp.lt.u32.totalorder %s3474_s21, %s3470_s20  ;;  %p3478_p1 = scmp.lt.u32.totalorder %s3470_s20, %s4487_s14 }
0x1319   : > { %p3472_p7 = pnand %p3471_p13, %p4684_p4 }
0x131a   : > { %p3477_p5 = por %p3476_p2, %p3475_p8 }
0x131b   : > { %p3473_p6 = pneg %p3472_p7 }
0x131c   : > { %p3479_p0 = por %p3478_p1, %p3477_p5 }
0x131e   : > { %p3480_p9 = pnand %p3479_p0, %p3473_p6 }
0x1320   : > { %3483 = shalt.err (!%p3480_p9)
}
0x1321   : > { %2980 = dma.vmem_to_hbm [thread:$0]  (%p4684_p4), %s2347_s8, 128, %s4487_s14, %s2333_s6  }
0x1322 PF: > { %s4685_s2 = sld [smem:[#allocation26_spill]]  ;;  %s4686_s28 = sld [smem:[#allocation21_spill]] }
0x1323   : > { %s4687_s19 = sld [smem:[#allocation32_spill]] }
0x1328   : > { %p3015_p3 = scmp.ge.s32.totalorder %s4685_s2, 2  ;;  %s2358_s16 = sand.u32 1, %s4686_s28  }
0x1329   : > { %p4688_p11 = scmp.ne.s32.totalorder %s4687_s19, 0  ;;  %s2359_s3 = scalar_lea.sflag [#allocation5], %s2358_s16 }
0x132b   : > { %p3009_p10 = pnand %p3015_p3, %p4688_p11 }
0x132d   : > { %3541 = dma.done.wait (!%p3009_p10), %s2359_s3, 128  }
0x132e   : > { %3543 = vsyncadd (!%p3009_p10), %s2359_s3, 4294967168  ;;  %s35_s2 = sadd.s32 1, %s4685_s2   ;;  %s4689_s27 = sld [smem:[#allocation19_spill]] }
0x132f   : > { %p32_p12 = scmp.ge.s32.totalorder %s35_s2, 6   ;;  %s4690_s28 = sld [smem:[#allocation20_spill]] }
0x1330   : > { %s4691_s29 = sld [smem:[#allocation29_spill]]  ;;  %s4692_s4 = sld [smem:[#allocation22_spill]] }
0x1331   : > { %s4693_s19 = sld [smem:[#allocation30_spill]]  ;;  %s4694_s1 = sld [smem:[#allocation24_spill]] }
0x1332   : > { %s4695_s20 = sld [smem:[#allocation25_spill]]  ;;  %s4696_s21 = sld [smem:[#allocation27_spill]] }
0x1333   : > { %s4697_s22 = sld [smem:[#allocation28_spill]]  ;;  %s4698_s30 = smov %s3562_s0 }
0x1334   :  { %34 = sbr.rel (!%p32_p12) target bundleno = 30 (0x1e), region = 236 }
0x1336   : > { %s4699_s0 = smov %s4692_s4 }
0x133b   :  { %2364 = vsyncpa [#allocation4], 1 }
0x133c   :  { %2366 = vsyncpa [#allocation4 + $0x1], 1 }
0x133d   :  { %2367 = vsyncpa [#allocation7], 1 }
0x133e   :  { %2368 = vsyncpa [#allocation5], 1 }
0x133f   :  { %2370 = vsyncpa [#allocation5 + $0x1], 1 }

</bundles_post_ra>
